<compile_context>
chip_gen: v7x
topology: tpu7x:2x2x1
jax: 0.10.0
libtpu: 0.0.40
codegen_flags: <defaults>
</compile_context>

<pallas_src>
import functools

import jax
import jax.numpy as jnp
from jax.experimental import pallas as pl
from jax.experimental.pallas import tpu as pltpu


def _round_up(n, m):
    return ((n + m - 1) // m) * m


def _linear(x, w_ref, b_ref):
    # Matmul in the weight dtype (bf16 by default, f32 optional); f32 accumulate
    # and f32 bias add (v5e VPU has no bf16).
    return jnp.dot(x.astype(w_ref.dtype), w_ref[...],
                   preferred_element_type=jnp.float32) + b_ref[...]


def vae_forward_kernel(
    latent_dim, input_dim,
    # batch-tiled inputs
    x_ref, eps_ref,
    # resident weights / biases
    we1_ref, be1_ref, we2_ref, be2_ref,      # encoder Linear x2
    wz_ref, bz_ref,                          # fused [fc_mu | fc_logvar]
    wd1_ref, bd1_ref, wd2_ref, bd2_ref,      # decoder Linear x2
    wx_ref, bx_ref,                          # fused [fc_recon_mu | fc_recon_logvar]
    # outputs (PyTorch forward order)
    mu_x_ref, logvar_x_ref, mu_z_ref, logvar_z_ref,
):
    x = x_ref[...]

    # ---- encode: Linear -> ReLU -> Linear -> ReLU ----
    h1 = jnp.maximum(_linear(x, we1_ref, be1_ref), 0.0)
    h2 = jnp.maximum(_linear(h1, we2_ref, be2_ref), 0.0)

    # fused mu/logvar head: one wide matmul, split inside VMEM (lane select)
    zcat = _linear(h2, wz_ref, bz_ref)
    mu_z = zcat[:, :latent_dim]
    logvar_z = zcat[:, latent_dim:]

    # ---- reparameterize: z = mu + eps * exp(0.5 * logvar)  (f32 elementwise) ----
    z = mu_z + eps_ref[...] * jnp.exp(0.5 * logvar_z)

    # ---- decode: Linear -> ReLU -> Linear -> Tanh ----
    d1 = jnp.maximum(_linear(z, wd1_ref, bd1_ref), 0.0)
    d2 = jnp.tanh(_linear(d1, wd2_ref, bd2_ref))

    # fused recon mu/logvar head
    xcat = _linear(d2, wx_ref, bx_ref)

    mu_x_ref[...] = xcat[:, :input_dim].astype(mu_x_ref.dtype)
    logvar_x_ref[...] = xcat[:, input_dim:].astype(logvar_x_ref.dtype)
    mu_z_ref[...] = mu_z.astype(mu_z_ref.dtype)
    logvar_z_ref[...] = logvar_z.astype(logvar_z_ref.dtype)


def prepare_params(params, compute_dtype=jnp.bfloat16):
    """One-time parameter prep: fuse the per-stage heads into one wide weight and
    cast matmul weights to compute_dtype (bf16 default -- MXU-native on all gens).
    Biases stay f32 (bias add is elementwise / VPU)."""
    wz = jnp.concatenate([params["w_mu"], params["w_logvar"]], axis=1)
    bz = jnp.concatenate([params["b_mu"], params["b_logvar"]], axis=1)
    wx = jnp.concatenate([params["w_recon_mu"], params["w_recon_logvar"]], axis=1)
    bx = jnp.concatenate([params["b_recon_mu"], params["b_recon_logvar"]], axis=1)
    weights = [params["w_e1"], params["w_e2"], wz,
               params["w_d1"], params["w_d2"], wx]
    biases = [params["b_e1"], params["b_e2"], bz,
              params["b_d1"], params["b_d2"], bx]
    weights = tuple(w.astype(compute_dtype) for w in weights)
    biases = tuple(b.astype(jnp.float32) for b in biases)
    return weights, biases


def _choose_tile_b(B, tile_b, min_grid_steps):
    """Largest batch tile <= requested, multiple of 8, and -- when the batch is
    big enough -- small enough that the grid keeps >= min_grid_steps steps
    (so v7x can shard the 'parallel' axis across both TensorCores)."""
    tile = max(8, min(_round_up(tile_b, 8), _round_up(B, 8)))
    while min_grid_steps > 1 and tile > 8 and pl.cdiv(B, tile) < min_grid_steps:
        tile = max(8, _round_up(tile // 2, 8))
    return tile


def _vmem_budget_bytes(tile_b, input_dim, hidden1, hidden2, latent_dim,
                       weights, biases, out_dtype):
    """Explicit VMEM budget: single-buffered resident weights, double-buffered
    streamed batch blocks, intermediate activation slabs, plus headroom."""
    resident = sum(int(a.size) * a.dtype.itemsize
                   for a in list(weights) + list(biases))
    out_isz = jnp.dtype(out_dtype).itemsize
    streamed = 2 * (tile_b * (input_dim + latent_dim) * 4          # x, eps (f32)
                    + tile_b * 2 * (input_dim + latent_dim) * out_isz)
    interm = tile_b * (hidden1 + hidden2 + 2 * latent_dim
                       + hidden2 + hidden1 + 2 * input_dim) * 4
    budget = int(1.5 * (resident + streamed + 2 * interm)) + (4 << 20)
    return max(32 << 20, min(budget, 128 << 20))


def vae_forward(x, eps, weights, biases, *, tile_b=256,
                out_dtype=jnp.float32, min_grid_steps=2):
    """Fused, batch-tiled VAE forward.

    x:   [B, input_dim] f32
    eps: [B, latent_dim] f32  (plays the role of torch.randn_like(std))
    weights/biases: output of prepare_params().
    Returns (mu_x, logvar_x, mu_z, logvar_z) in out_dtype.
    """
    B, input_dim = x.shape
    latent_dim = eps.shape[1]
    hidden1 = weights[0].shape[1]
    hidden2 = weights[1].shape[1]

    tile_b = _choose_tile_b(B, tile_b, min_grid_steps)
    grid = (pl.cdiv(B, tile_b),)   # ragged tail handled by Pallas block masking

    batch_map = lambda b: (b, 0)   # streamed over batch
    const_map = lambda b: (0, 0)   # resident across grid steps

    in_specs = [
        pl.BlockSpec((tile_b, input_dim), batch_map),    # x
        pl.BlockSpec((tile_b, latent_dim), batch_map),   # eps
    ]
    args = [x, eps]
    for w, bvec in zip(weights, biases):
        args += [w, bvec]
        # Constant index_map blocks never change -> single-buffer to halve
        # their VMEM footprint.
        in_specs += [
            pl.BlockSpec(w.shape, const_map, pipeline_mode=pl.Buffered(1)),
            pl.BlockSpec(bvec.shape, const_map, pipeline_mode=pl.Buffered(1)),
        ]

    out_shape = (
        jax.ShapeDtypeStruct((B, input_dim), out_dtype),    # mu_x
        jax.ShapeDtypeStruct((B, input_dim), out_dtype),    # logvar_x
        jax.ShapeDtypeStruct((B, latent_dim), out_dtype),   # mu_z
        jax.ShapeDtypeStruct((B, latent_dim), out_dtype),   # logvar_z
    )
    out_specs = (
        pl.BlockSpec((tile_b, input_dim), batch_map),
        pl.BlockSpec((tile_b, input_dim), batch_map),
        pl.BlockSpec((tile_b, latent_dim), batch_map),
        pl.BlockSpec((tile_b, latent_dim), batch_map),
    )

    vmem_limit = _vmem_budget_bytes(tile_b, input_dim, hidden1, hidden2,
                                    latent_dim, weights, biases, out_dtype)

    return pl.pallas_call(
        functools.partial(vae_forward_kernel, latent_dim, input_dim),
        out_shape=out_shape,
        grid=grid,
        in_specs=in_specs,
        out_specs=out_specs,
        compiler_params=pltpu.CompilerParams(
            dimension_semantics=("parallel",),   # shard batch steps across v7x's 2 TCs
            vmem_limit_bytes=vmem_limit),
    )(*args)


def init_linear(key, fan_in, fan_out):
    """PyTorch-style uniform(-1/sqrt(fan_in), 1/sqrt(fan_in)) init, stored [in, out]."""
    kw, kb = jax.random.split(key)
    bound = 1.0 / jnp.sqrt(jnp.float32(fan_in))
    w = jax.random.uniform(kw, (fan_in, fan_out), jnp.float32, -bound, bound)
    b = jax.random.uniform(kb, (1, fan_out), jnp.float32, -bound, bound)
    return w, b


def init_params(key, input_dim, hidden_dim1, hidden_dim2, latent_dim):
    keys = jax.random.split(key, 8)
    p = {}
    p["w_e1"], p["b_e1"] = init_linear(keys[0], input_dim, hidden_dim1)
    p["w_e2"], p["b_e2"] = init_linear(keys[1], hidden_dim1, hidden_dim2)
    p["w_mu"], p["b_mu"] = init_linear(keys[2], hidden_dim2, latent_dim)
    p["w_logvar"], p["b_logvar"] = init_linear(keys[3], hidden_dim2, latent_dim)
    p["w_d1"], p["b_d1"] = init_linear(keys[4], latent_dim, hidden_dim2)
    p["w_d2"], p["b_d2"] = init_linear(keys[5], hidden_dim2, hidden_dim1)
    p["w_recon_mu"], p["b_recon_mu"] = init_linear(keys[6], hidden_dim1, input_dim)
    p["w_recon_logvar"], p["b_recon_logvar"] = init_linear(keys[7], hidden_dim1, input_dim)
    return p


def vae_forward_ref(x, eps, p, compute_dtype=jnp.float32):
    """Pure-JAX reference mirroring the PyTorch forward (matmuls in compute_dtype)."""
    def lin(a, w, b):
        return jnp.dot(a.astype(compute_dtype), w.astype(compute_dtype),
                       preferred_element_type=jnp.float32) + b
    h1 = jnp.maximum(lin(x, p["w_e1"], p["b_e1"]), 0.0)
    h2 = jnp.maximum(lin(h1, p["w_e2"], p["b_e2"]), 0.0)
    mu_z = lin(h2, p["w_mu"], p["b_mu"])
    logvar_z = lin(h2, p["w_logvar"], p["b_logvar"])
    z = mu_z + eps * jnp.exp(0.5 * logvar_z)
    d1 = jnp.maximum(lin(z, p["w_d1"], p["b_d1"]), 0.0)
    d2 = jnp.tanh(lin(d1, p["w_d2"], p["b_d2"]))
    mu_x = lin(d2, p["w_recon_mu"], p["b_recon_mu"])
    logvar_x = lin(d2, p["w_recon_logvar"], p["b_recon_logvar"])
    return mu_x, logvar_x, mu_z, logvar_z


if __name__ == "__main__":
    # Small, lane-friendly dims consistent with the module's constructor params.
    B, INPUT_DIM, HIDDEN1, HIDDEN2, LATENT = 256, 128, 256, 128, 64

    key = jax.random.PRNGKey(0)
    k_params, k_x, k_eps = jax.random.split(key, 3)

    params = init_params(k_params, INPUT_DIM, HIDDEN1, HIDDEN2, LATENT)
    x = jax.random.normal(k_x, (B, INPUT_DIM), jnp.float32)
    # eps plays the role of torch.randn_like(std) in reparameterize.
    eps = jax.random.normal(k_eps, (B, LATENT), jnp.float32)

    # Default bf16-matmul path (MXU-native on v5e/v6e/v7x), f32 outputs.
    w_bf16, b_bf16 = prepare_params(params)                      # one-time prep
    outs = jax.block_until_ready(vae_forward(x, eps, w_bf16, b_bf16))
    refs = vae_forward_ref(x, eps, params, compute_dtype=jnp.bfloat16)
    for o, r in zip(outs, refs):
        assert o.shape == r.shape and o.dtype == r.dtype
        assert jnp.allclose(o, r, atol=5e-3, rtol=5e-3)

    # Optional f32-matmul path (e.g. if mu/logvar precision matters downstream).
    w_f32, b_f32 = prepare_params(params, compute_dtype=jnp.float32)
    outs_f32 = jax.block_until_ready(vae_forward(x, eps, w_f32, b_f32))
    refs_f32 = vae_forward_ref(x, eps, params, compute_dtype=jnp.float32)
    for o, r in zip(outs_f32, refs_f32):
        assert o.shape == r.shape and o.dtype == r.dtype
        assert jnp.allclose(o, r, atol=1e-4, rtol=1e-4)

    # Optional bf16 outputs: halves the (dominant) output HBM stream on v6e/v7x.
    outs_bf16_out = jax.block_until_ready(
        vae_forward(x, eps, w_bf16, b_bf16, out_dtype=jnp.bfloat16))
    for o, r in zip(outs_bf16_out, refs):
        assert o.shape == r.shape and o.dtype == jnp.bfloat16
        assert jnp.allclose(o.astype(jnp.float32), r, atol=5e-2, rtol=5e-2)

    print("KERNEL_OK")
</pallas_src>

<mosaic_0001>
module attributes {stable_mosaic.version = 11 : i64} {
  func.func @vae_forward_kernel(%arg0: i32, %arg1: memref<128x128xf32, #tpu.memory_space<vmem>>, %arg2: memref<128x64xf32, #tpu.memory_space<vmem>>, %arg3: memref<128x256xbf16, #tpu.memory_space<vmem>>, %arg4: memref<1x256xf32, #tpu.memory_space<vmem>>, %arg5: memref<256x128xbf16, #tpu.memory_space<vmem>>, %arg6: memref<1x128xf32, #tpu.memory_space<vmem>>, %arg7: memref<128x128xbf16, #tpu.memory_space<vmem>>, %arg8: memref<1x128xf32, #tpu.memory_space<vmem>>, %arg9: memref<64x128xbf16, #tpu.memory_space<vmem>>, %arg10: memref<1x128xf32, #tpu.memory_space<vmem>>, %arg11: memref<128x256xbf16, #tpu.memory_space<vmem>>, %arg12: memref<1x256xf32, #tpu.memory_space<vmem>>, %arg13: memref<256x256xbf16, #tpu.memory_space<vmem>>, %arg14: memref<1x256xf32, #tpu.memory_space<vmem>>, %arg15: memref<128x128xf32, #tpu.memory_space<vmem>>, %arg16: memref<128x128xf32, #tpu.memory_space<vmem>>, %arg17: memref<128x64xf32, #tpu.memory_space<vmem>>, %arg18: memref<128x64xf32, #tpu.memory_space<vmem>>) attributes {dimension_semantics = [#tpu.dimension_semantics<parallel>], iteration_bounds = array<i64: 2>, scalar_prefetch = 0 : i64, scratch_operands = 0 : i64, tpu.core_type = #tpu.core_type<tc>, window_params = [{transform_indices = @transform_0, window_bounds = array<i64: 128, 128>}, {transform_indices = @transform_1, window_bounds = array<i64: 128, 64>}, {pipeline_mode = #tpu.pipeline_mode<synchronous>, transform_indices = @transform_2, window_bounds = array<i64: 128, 256>}, {pipeline_mode = #tpu.pipeline_mode<synchronous>, transform_indices = @transform_3, window_bounds = array<i64: 1, 256>}, {pipeline_mode = #tpu.pipeline_mode<synchronous>, transform_indices = @transform_4, window_bounds = array<i64: 256, 128>}, {pipeline_mode = #tpu.pipeline_mode<synchronous>, transform_indices = @transform_5, window_bounds = array<i64: 1, 128>}, {pipeline_mode = #tpu.pipeline_mode<synchronous>, transform_indices = @transform_6, window_bounds = array<i64: 128, 128>}, {pipeline_mode = #tpu.pipeline_mode<synchronous>, transform_indices = @transform_7, window_bounds = array<i64: 1, 128>}, {pipeline_mode = #tpu.pipeline_mode<synchronous>, transform_indices = @transform_8, window_bounds = array<i64: 64, 128>}, {pipeline_mode = #tpu.pipeline_mode<synchronous>, transform_indices = @transform_9, window_bounds = array<i64: 1, 128>}, {pipeline_mode = #tpu.pipeline_mode<synchronous>, transform_indices = @transform_10, window_bounds = array<i64: 128, 256>}, {pipeline_mode = #tpu.pipeline_mode<synchronous>, transform_indices = @transform_11, window_bounds = array<i64: 1, 256>}, {pipeline_mode = #tpu.pipeline_mode<synchronous>, transform_indices = @transform_12, window_bounds = array<i64: 256, 256>}, {pipeline_mode = #tpu.pipeline_mode<synchronous>, transform_indices = @transform_13, window_bounds = array<i64: 1, 256>}, {transform_indices = @transform_14, window_bounds = array<i64: 128, 128>}, {transform_indices = @transform_15, window_bounds = array<i64: 128, 128>}, {transform_indices = @transform_16, window_bounds = array<i64: 128, 64>}, {transform_indices = @transform_17, window_bounds = array<i64: 128, 64>}]} {
    %c0 = arith.constant 0 : index
    %c0_0 = arith.constant 0 : index
    %0 = vector.load %arg1[%c0, %c0_0] : memref<128x128xf32, #tpu.memory_space<vmem>>, vector<128x128xf32>
    %1 = arith.truncf %0 : vector<128x128xf32> to vector<128x128xbf16>
    %c0_1 = arith.constant 0 : index
    %c0_2 = arith.constant 0 : index
    %2 = vector.load %arg3[%c0_1, %c0_2] : memref<128x256xbf16, #tpu.memory_space<vmem>>, vector<128x256xbf16>
    %cst = arith.constant dense<0.000000e+00> : vector<128x256xf32>
    %3 = tpu.matmul %1, %2, %cst {dimension_numbers = #tpu.dot_dimension_numbers<[1], [0], [0], [1], [0, 0, 1, 1], [], []>} : vector<128x128xbf16>, vector<128x256xbf16>, vector<128x256xf32> -> vector<128x256xf32>
    %c0_3 = arith.constant 0 : index
    %c0_4 = arith.constant 0 : index
    %4 = vector.load %arg4[%c0_3, %c0_4] : memref<1x256xf32, #tpu.memory_space<vmem>>, vector<1x256xf32>
    %5 = vector.broadcast %4 : vector<1x256xf32> to vector<128x256xf32>
    %6 = arith.addf %3, %5 : vector<128x256xf32>
    %cst_5 = arith.constant 0.000000e+00 : f32
    %7 = vector.broadcast %cst_5 : f32 to vector<128x256xf32>
    %8 = arith.maximumf %6, %7 : vector<128x256xf32>
    %9 = arith.truncf %8 : vector<128x256xf32> to vector<128x256xbf16>
    %c0_6 = arith.constant 0 : index
    %c0_7 = arith.constant 0 : index
    %10 = vector.load %arg5[%c0_6, %c0_7] : memref<256x128xbf16, #tpu.memory_space<vmem>>, vector<256x128xbf16>
    %cst_8 = arith.constant dense<0.000000e+00> : vector<128x128xf32>
    %11 = tpu.matmul %9, %10, %cst_8 {dimension_numbers = #tpu.dot_dimension_numbers<[1], [0], [0], [1], [0, 0, 1, 1], [], []>} : vector<128x256xbf16>, vector<256x128xbf16>, vector<128x128xf32> -> vector<128x128xf32>
    %c0_9 = arith.constant 0 : index
    %c0_10 = arith.constant 0 : index
    %12 = vector.load %arg6[%c0_9, %c0_10] : memref<1x128xf32, #tpu.memory_space<vmem>>, vector<1x128xf32>
    %13 = vector.broadcast %12 : vector<1x128xf32> to vector<128x128xf32>
    %14 = arith.addf %11, %13 : vector<128x128xf32>
    %cst_11 = arith.constant 0.000000e+00 : f32
    %15 = vector.broadcast %cst_11 : f32 to vector<128x128xf32>
    %16 = arith.maximumf %14, %15 : vector<128x128xf32>
    %17 = arith.truncf %16 : vector<128x128xf32> to vector<128x128xbf16>
    %c0_12 = arith.constant 0 : index
    %c0_13 = arith.constant 0 : index
    %18 = vector.load %arg7[%c0_12, %c0_13] : memref<128x128xbf16, #tpu.memory_space<vmem>>, vector<128x128xbf16>
    %cst_14 = arith.constant dense<0.000000e+00> : vector<128x128xf32>
    %19 = tpu.matmul %17, %18, %cst_14 {dimension_numbers = #tpu.dot_dimension_numbers<[1], [0], [0], [1], [0, 0, 1, 1], [], []>} : vector<128x128xbf16>, vector<128x128xbf16>, vector<128x128xf32> -> vector<128x128xf32>
    %c0_15 = arith.constant 0 : index
    %c0_16 = arith.constant 0 : index
    %20 = vector.load %arg8[%c0_15, %c0_16] : memref<1x128xf32, #tpu.memory_space<vmem>>, vector<1x128xf32>
    %21 = vector.broadcast %20 : vector<1x128xf32> to vector<128x128xf32>
    %22 = arith.addf %19, %21 : vector<128x128xf32>
    %23 = vector.extract_strided_slice %22 {offsets = [0, 0], sizes = [128, 64], strides = [1, 1]} : vector<128x128xf32> to vector<128x64xf32>
    %24 = vector.extract_strided_slice %22 {offsets = [0, 64], sizes = [128, 64], strides = [1, 1]} : vector<128x128xf32> to vector<128x64xf32>
    %c0_17 = arith.constant 0 : index
    %c0_18 = arith.constant 0 : index
    %25 = vector.load %arg2[%c0_17, %c0_18] : memref<128x64xf32, #tpu.memory_space<vmem>>, vector<128x64xf32>
    %cst_19 = arith.constant 5.000000e-01 : f32
    %26 = vector.broadcast %cst_19 : f32 to vector<128x64xf32>
    %27 = arith.mulf %26, %24 : vector<128x64xf32>
    %28 = math.exp %27 : vector<128x64xf32>
    %29 = arith.mulf %25, %28 : vector<128x64xf32>
    %30 = arith.addf %23, %29 : vector<128x64xf32>
    %31 = arith.truncf %30 : vector<128x64xf32> to vector<128x64xbf16>
    %c0_20 = arith.constant 0 : index
    %c0_21 = arith.constant 0 : index
    %32 = vector.load %arg9[%c0_20, %c0_21] : memref<64x128xbf16, #tpu.memory_space<vmem>>, vector<64x128xbf16>
    %cst_22 = arith.constant dense<0.000000e+00> : vector<128x128xf32>
    %33 = tpu.matmul %31, %32, %cst_22 {dimension_numbers = #tpu.dot_dimension_numbers<[1], [0], [0], [1], [0, 0, 1, 1], [], []>} : vector<128x64xbf16>, vector<64x128xbf16>, vector<128x128xf32> -> vector<128x128xf32>
    %c0_23 = arith.constant 0 : index
    %c0_24 = arith.constant 0 : index
    %34 = vector.load %arg10[%c0_23, %c0_24] : memref<1x128xf32, #tpu.memory_space<vmem>>, vector<1x128xf32>
    %35 = vector.broadcast %34 : vector<1x128xf32> to vector<128x128xf32>
    %36 = arith.addf %33, %35 : vector<128x128xf32>
    %cst_25 = arith.constant 0.000000e+00 : f32
    %37 = vector.broadcast %cst_25 : f32 to vector<128x128xf32>
    %38 = arith.maximumf %36, %37 : vector<128x128xf32>
    %39 = arith.truncf %38 : vector<128x128xf32> to vector<128x128xbf16>
    %c0_26 = arith.constant 0 : index
    %c0_27 = arith.constant 0 : index
    %40 = vector.load %arg11[%c0_26, %c0_27] : memref<128x256xbf16, #tpu.memory_space<vmem>>, vector<128x256xbf16>
    %cst_28 = arith.constant dense<0.000000e+00> : vector<128x256xf32>
    %41 = tpu.matmul %39, %40, %cst_28 {dimension_numbers = #tpu.dot_dimension_numbers<[1], [0], [0], [1], [0, 0, 1, 1], [], []>} : vector<128x128xbf16>, vector<128x256xbf16>, vector<128x256xf32> -> vector<128x256xf32>
    %c0_29 = arith.constant 0 : index
    %c0_30 = arith.constant 0 : index
    %42 = vector.load %arg12[%c0_29, %c0_30] : memref<1x256xf32, #tpu.memory_space<vmem>>, vector<1x256xf32>
    %43 = vector.broadcast %42 : vector<1x256xf32> to vector<128x256xf32>
    %44 = arith.addf %41, %43 : vector<128x256xf32>
    %45 = math.tanh %44 : vector<128x256xf32>
    %46 = arith.truncf %45 : vector<128x256xf32> to vector<128x256xbf16>
    %c0_31 = arith.constant 0 : index
    %c0_32 = arith.constant 0 : index
    %47 = vector.load %arg13[%c0_31, %c0_32] : memref<256x256xbf16, #tpu.memory_space<vmem>>, vector<256x256xbf16>
    %cst_33 = arith.constant dense<0.000000e+00> : vector<128x256xf32>
    %48 = tpu.matmul %46, %47, %cst_33 {dimension_numbers = #tpu.dot_dimension_numbers<[1], [0], [0], [1], [0, 0, 1, 1], [], []>} : vector<128x256xbf16>, vector<256x256xbf16>, vector<128x256xf32> -> vector<128x256xf32>
    %c0_34 = arith.constant 0 : index
    %c0_35 = arith.constant 0 : index
    %49 = vector.load %arg14[%c0_34, %c0_35] : memref<1x256xf32, #tpu.memory_space<vmem>>, vector<1x256xf32>
    %50 = vector.broadcast %49 : vector<1x256xf32> to vector<128x256xf32>
    %51 = arith.addf %48, %50 : vector<128x256xf32>
    %52 = vector.extract_strided_slice %51 {offsets = [0, 0], sizes = [128, 128], strides = [1, 1]} : vector<128x256xf32> to vector<128x128xf32>
    %c0_36 = arith.constant 0 : index
    %c0_37 = arith.constant 0 : index
    %53 = vector.load %arg15[%c0_36, %c0_37] : memref<128x128xf32, #tpu.memory_space<vmem>>, vector<128x128xf32>
    tpu.vector_store %arg15[%c0_36, %c0_37], %52 {strides = array<i32>} : memref<128x128xf32, #tpu.memory_space<vmem>>, vector<128x128xf32>,
    %54 = vector.extract_strided_slice %51 {offsets = [0, 128], sizes = [128, 128], strides = [1, 1]} : vector<128x256xf32> to vector<128x128xf32>
    %c0_38 = arith.constant 0 : index
    %c0_39 = arith.constant 0 : index
    %55 = vector.load %arg16[%c0_38, %c0_39] : memref<128x128xf32, #tpu.memory_space<vmem>>, vector<128x128xf32>
    tpu.vector_store %arg16[%c0_38, %c0_39], %54 {strides = array<i32>} : memref<128x128xf32, #tpu.memory_space<vmem>>, vector<128x128xf32>,
    %c0_40 = arith.constant 0 : index
    %c0_41 = arith.constant 0 : index
    %56 = vector.load %arg17[%c0_40, %c0_41] : memref<128x64xf32, #tpu.memory_space<vmem>>, vector<128x64xf32>
    tpu.vector_store %arg17[%c0_40, %c0_41], %23 {strides = array<i32>} : memref<128x64xf32, #tpu.memory_space<vmem>>, vector<128x64xf32>,
    %c0_42 = arith.constant 0 : index
    %c0_43 = arith.constant 0 : index
    %57 = vector.load %arg18[%c0_42, %c0_43] : memref<128x64xf32, #tpu.memory_space<vmem>>, vector<128x64xf32>
    tpu.vector_store %arg18[%c0_42, %c0_43], %24 {strides = array<i32>} : memref<128x64xf32, #tpu.memory_space<vmem>>, vector<128x64xf32>,
    return
  }
  func.func @transform_0(%arg0: i32) -> (i32, i32) {
    %c0_i32 = arith.constant 0 : i32
    %c0_i32_0 = arith.constant 0 : i32
    return %arg0, %c0_i32 : i32, i32
  }
  func.func @transform_1(%arg0: i32) -> (i32, i32) {
    %c0_i32 = arith.constant 0 : i32
    %c0_i32_0 = arith.constant 0 : i32
    return %arg0, %c0_i32 : i32, i32
  }
  func.func @transform_2(%arg0: i32) -> (i32, i32) {
    %c0_i32 = arith.constant 0 : i32
    %c0_i32_0 = arith.constant 0 : i32
    %c0_i32_1 = arith.constant 0 : i32
    return %c0_i32, %c0_i32_0 : i32, i32
  }
  func.func @transform_3(%arg0: i32) -> (i32, i32) {
    %c0_i32 = arith.constant 0 : i32
    %c0_i32_0 = arith.constant 0 : i32
    %c0_i32_1 = arith.constant 0 : i32
    return %c0_i32, %c0_i32_0 : i32, i32
  }
  func.func @transform_4(%arg0: i32) -> (i32, i32) {
    %c0_i32 = arith.constant 0 : i32
    %c0_i32_0 = arith.constant 0 : i32
    %c0_i32_1 = arith.constant 0 : i32
    return %c0_i32, %c0_i32_0 : i32, i32
  }
  func.func @transform_5(%arg0: i32) -> (i32, i32) {
    %c0_i32 = arith.constant 0 : i32
    %c0_i32_0 = arith.constant 0 : i32
    %c0_i32_1 = arith.constant 0 : i32
    return %c0_i32, %c0_i32_0 : i32, i32
  }
  func.func @transform_6(%arg0: i32) -> (i32, i32) {
    %c0_i32 = arith.constant 0 : i32
    %c0_i32_0 = arith.constant 0 : i32
    %c0_i32_1 = arith.constant 0 : i32
    return %c0_i32, %c0_i32_0 : i32, i32
  }
  func.func @transform_7(%arg0: i32) -> (i32, i32) {
    %c0_i32 = arith.constant 0 : i32
    %c0_i32_0 = arith.constant 0 : i32
    %c0_i32_1 = arith.constant 0 : i32
    return %c0_i32, %c0_i32_0 : i32, i32
  }
  func.func @transform_8(%arg0: i32) -> (i32, i32) {
    %c0_i32 = arith.constant 0 : i32
    %c0_i32_0 = arith.constant 0 : i32
    %c0_i32_1 = arith.constant 0 : i32
    return %c0_i32, %c0_i32_0 : i32, i32
  }
  func.func @transform_9(%arg0: i32) -> (i32, i32) {
    %c0_i32 = arith.constant 0 : i32
    %c0_i32_0 = arith.constant 0 : i32
    %c0_i32_1 = arith.constant 0 : i32
    return %c0_i32, %c0_i32_0 : i32, i32
  }
  func.func @transform_10(%arg0: i32) -> (i32, i32) {
    %c0_i32 = arith.constant 0 : i32
    %c0_i32_0 = arith.constant 0 : i32
    %c0_i32_1 = arith.constant 0 : i32
    return %c0_i32, %c0_i32_0 : i32, i32
  }
  func.func @transform_11(%arg0: i32) -> (i32, i32) {
    %c0_i32 = arith.constant 0 : i32
    %c0_i32_0 = arith.constant 0 : i32
    %c0_i32_1 = arith.constant 0 : i32
    return %c0_i32, %c0_i32_0 : i32, i32
  }
  func.func @transform_12(%arg0: i32) -> (i32, i32) {
    %c0_i32 = arith.constant 0 : i32
    %c0_i32_0 = arith.constant 0 : i32
    %c0_i32_1 = arith.constant 0 : i32
    return %c0_i32, %c0_i32_0 : i32, i32
  }
  func.func @transform_13(%arg0: i32) -> (i32, i32) {
    %c0_i32 = arith.constant 0 : i32
    %c0_i32_0 = arith.constant 0 : i32
    %c0_i32_1 = arith.constant 0 : i32
    return %c0_i32, %c0_i32_0 : i32, i32
  }
  func.func @transform_14(%arg0: i32) -> (i32, i32) {
    %c0_i32 = arith.constant 0 : i32
    %c0_i32_0 = arith.constant 0 : i32
    return %arg0, %c0_i32 : i32, i32
  }
  func.func @transform_15(%arg0: i32) -> (i32, i32) {
    %c0_i32 = arith.constant 0 : i32
    %c0_i32_0 = arith.constant 0 : i32
    return %arg0, %c0_i32 : i32, i32
  }
  func.func @transform_16(%arg0: i32) -> (i32, i32) {
    %c0_i32 = arith.constant 0 : i32
    %c0_i32_0 = arith.constant 0 : i32
    return %arg0, %c0_i32 : i32, i32
  }
  func.func @transform_17(%arg0: i32) -> (i32, i32) {
    %c0_i32 = arith.constant 0 : i32
    %c0_i32_0 = arith.constant 0 : i32
    return %arg0, %c0_i32 : i32, i32
  }
}

</mosaic_0001>

<bundles_post_ra>
// kernel: tpu_custom_call.1
= control target key start
LH: loop header
LB: loop body
LE: loop exit
PB: predicated region body
PF: predicated region fallthrough
CT: control target
= control target key end

     0   :  { %s4625_s0 = inlined_call_operand.vmem [shape: f32[256,128], index: 0, kind: input, shape index: {}]   ;;  %s4626_s1 = inlined_call_operand.vmem [shape: f32[256,64], index: 1, kind: input, shape index: {}]   ;;  %s4627_s2 = inlined_call_operand.vmem [shape: bf16[128,256], index: 2, kind: input, shape index: {}]   ;;  %s4628_s3 = inlined_call_operand.vmem [shape: f32[1,256], index: 3, kind: input, shape index: {}]   ;;  %s4629_s4 = inlined_call_operand.hbm [shape: bf16[256,128], index: 4, kind: input, shape index: {}]   ;;  %s4630_s5 = inlined_call_operand.vmem [shape: f32[1,128], index: 5, kind: input, shape index: {}]   ;;  %s4631_s6 = inlined_call_operand.hbm [shape: bf16[128,128], index: 6, kind: input, shape index: {}]   ;;  %s4632_s7 = inlined_call_operand.vmem [shape: f32[1,128], index: 7, kind: input, shape index: {}]   ;;  %s4633_s8 = inlined_call_operand.hbm [shape: bf16[64,128], index: 8, kind: input, shape index: {}]   ;;  %s4634_s9 = inlined_call_operand.vmem [shape: f32[1,128], index: 9, kind: input, shape index: {}]   ;;  %s4635_s10 = inlined_call_operand.hbm [shape: bf16[128,256], index: 10, kind: input, shape index: {}]   ;;  %s4636_s11 = inlined_call_operand.vmem [shape: f32[1,256], index: 11, kind: input, shape index: {}]   ;;  %s4637_s12 = inlined_call_operand.hbm [shape: bf16[256,256], index: 12, kind: input, shape index: {}]   ;;  %s4638_s13 = inlined_call_operand.vmem [shape: f32[1,256], index: 13, kind: input, shape index: {}]   ;;  %s4639_s14 = inlined_call_operand.hbm [shape: f32[256,128], index: 14, kind: output, shape index: {0}]   ;;  %s4640_s15 = inlined_call_operand.hbm [shape: f32[256,128], index: 15, kind: output, shape index: {1}]   ;;  %s4641_s16 = inlined_call_operand.vmem [shape: f32[256,64], index: 16, kind: output, shape index: {2}]   ;;  %s4642_s17 = inlined_call_operand.vmem [shape: f32[256,64], index: 17, kind: output, shape index: {3}]  }
   0x1   :  { %4662 = sst [smem:[#allocation26_spill]] %s4625_s0 }
   0x2   :  { %4663 = sst [smem:[#allocation27_spill]] %s4626_s1 }
   0x3   :  { %4664 = sst [smem:[#allocation28_spill]] %s4631_s6 }
   0x4   :  { %4665 = sst [smem:[#allocation29_spill]] %s4638_s13 }
   0x5   :  { %4666 = sst [smem:[#allocation30_spill]] %s4639_s14 }
   0x6   :  { %4667 = sst [smem:[#allocation31_spill]] %s4640_s15 }
   0x7   :  { %23 = vsyncpa [#allocation3], 0 }
   0x8   :  { %24 = vsyncpa [#allocation6], 0 }
   0x9   :  { %25 = vsyncpa [#allocation9], 0 }
   0xa   :  { %26 = vsyncpa [#allocation4], 0 }
   0xb   :  { %28 = vsyncpa [#allocation4 + $0x1], 0 }
   0xc   :  { %29 = vsyncpa [#allocation13], 0 }
   0xd   :  { %31 = vsyncpa [#allocation13 + $0x1], 0  ;;  %s3720_s24 = smov 0   ;;  %s3722_s25 = smov 0  }
   0xe   :  { %s3724_s26 = smov 0   ;;  %s3726_s27 = smov 0  }
   0xf LB: > { %4668 = sst [smem:[#allocation19_spill]] %s3601_s24  ;;  %s3741_s28 = sadd.s32 4294967295, %s3613_s27   ;;  %s3613_s27 = sphi %s3726_s27, %s4703_s27   ;;  %s3609_s26 = sphi %s3724_s26, %s4705_s26   ;;  %s3605_s25 = sphi %s3722_s25, %s4707_s25   ;;  %s3601_s24 = sphi %s3720_s24, %s4706_s24  }
  0x10   : > { %4669 = sst [smem:[#allocation20_spill]] %s3609_s26  ;;  %s2727_s29 = sadd.s32 4294967294, %s3613_s27  }
  0x11   : > { %4670 = sst [smem:[#allocation21_spill]] %s3613_s27  ;;  %s3745_s0 = sadd.s32 1, %s3613_s27  }
  0x12   : > { %4671 = sst [smem:[#allocation22_spill]] %s3745_s0  ;;  %s348_s30 = sadd.s32 1, %s3609_s26 }
  0x13   : > { %s345_s18 = ssub.s32 %s3613_s27, %s3745_s0  ;;  %p358_p0 = scmp.ne.s32.totalorder %s3609_s26, %s3605_s25 }
  0x14   : > { %p346_p1 = scmp.eq.s32.totalorder %s345_s18, 0  ;;  %p359_p2 = scmp.eq.s32.totalorder %s3741_s28, 1 }
  0x15   : > { %p364_p3 = scmp.ne.s32.totalorder %s3605_s25, %s3601_s24  ;;  %p365_p4 = scmp.eq.s32.totalorder %s2727_s29, 1 }
  0x16   : > { %s3756_s19 = scalar_select %p346_p1, %s3609_s26, %s348_s30  }
  0x17   : > { %p3758_p5 = por %p359_p2, %p358_p0  ;;  %p3762_p6 = por %p365_p4, %p364_p3 }
  0x18   : > { %4672 = sst [smem:[#allocation23_spill]] %s3756_s19  ;;  %p2728_p7 = scmp.ge.s32.totalorder %s3613_s27, 1 }
  0x19   : > { %s4673_s1 = scalar_select %p3758_p5, 1, 0 }
  0x1a   : > { %s4675_s20 = scalar_select %p3762_p6, 1, 0 }
  0x1b   : > { %4674 = sst [smem:[#allocation24_spill]] %s4673_s1  ;;  %p450_p8 = scmp.lt.s32.totalorder %s3613_s27, 3 }
  0x1c   : > { %4676 = sst [smem:[#allocation25_spill]] %s4675_s20  ;;  %p4649_p9 = scmp.eq.s32.totalorder %s3741_s28, 0 }
  0x1d   : > { %p3769_p10 = pnand %p2728_p7, %p450_p8  ;;  %s3615_s22 = smov [#allocation5]  }
  0x1e   : > { %s484_s23 = sshll.u32 %s3615_s22, 4  ;;  %s3616_s30 = smov [#allocation8]   ;;  %s485_s23 = int_to_ptr.vmem [resolvable:$true] %s484_s23 }
  0x1f   : > { %s4677_s21 = scalar_select %p3769_p10, 1, 0 }
  0x20   : > { %p3068_p11 = pneg %p3769_p10  ;;  %s516_s18 = sshll.u32 %s3616_s30, 4  ;;  %s3781_s18 = int_to_ptr.vmem [resolvable:$true] %s516_s18 }
  0x21   : > { %s4679_s6 = sld [smem:[#allocation28_spill]] }
  0x22   : > { %p3777_p12 = pnand %p4649_p9, %p3068_p11 }
  0x24   : > { %p3791_p0 = pneg %p3777_p12 }
  0x27   : > { %s3367_s0 = scalar_lea.hbm %s4679_s6, 1024 }
  0x28   : > { %p3368_p13 = scmp.ne.s32.totalorder %s4679_s6, %s3367_s0  ;;  %p3374_p3 = scmp.lt.u32.totalorder %s3367_s0, %s4679_s6 }
  0x2a   : > { %p3370_p1 = pnand %p3791_p0, %p3368_p13 }
  0x2c   : > { %p3371_p2 = pneg %p3370_p1 }
  0x2e   : > { %p3376_p4 = pnand %p3374_p3, %p3371_p2 }
  0x30   : > { %3379 = shalt.err (!%p3376_p4)
}
  0x31   : > { %s3380_s26 = scalar_lea.vmem %s485_s23, 1024  ;;  %p3388_p9 = scmp.lt.s32.totalorder %s485_s23, %s485_s23 }
  0x32   : > { %p3381_p7 = scmp.ne.s32.totalorder %s485_s23, %s3380_s26  ;;  %p3389_p6 = scmp.lt.s32.totalorder %s3380_s26, %s3380_s26 }
  0x34   : > { %p3383_p8 = pnand %p3381_p7, %p3791_p0  ;;  %p3390_p5 = por %p3389_p6, %p3388_p9 }
  0x36   : > { %p3384_p11 = pneg %p3383_p8 }
  0x38   : > { %p3391_p10 = pnand %p3390_p5, %p3384_p11 }
  0x3a   : > { %3394 = shalt.err (!%p3391_p10)
}
  0x3b   : > { %s4656_s24 = smov 64   ;;  %s4658_s19 = smov 4  }
  0x3c   : > { %3074 = dma.hbm_to_vmem [thread:$0]  (!%p3777_p12), %s4679_s6, 1024, %s485_s23, [#allocation6], %s4656_s24, %s4656_s24, %s4658_s19  }
  0x3d   : > { %s3395_s15 = scalar_lea.hbm %s4635_s10, 2048 }
  0x3e   : > { %p3396_p5 = scmp.ne.s32.totalorder %s4635_s10, %s3395_s15  ;;  %p3402_p10 = scmp.lt.u32.totalorder %s3395_s15, %s4635_s10 }
  0x40   : > { %p3398_p6 = pnand %p3396_p5, %p3791_p0 }
  0x42   : > { %p3399_p9 = pneg %p3398_p6 }
  0x44   : > { %p3404_p13 = pnand %p3402_p10, %p3399_p9 }
  0x46   : > { %3407 = shalt.err (!%p3404_p13)
}
  0x47   : > { %s3408_s23 = scalar_lea.vmem %s3781_s18, 2048  ;;  %p3416_p4 = scmp.lt.s32.totalorder %s3781_s18, %s3781_s18 }
  0x48   : > { %p3409_p1 = scmp.ne.s32.totalorder %s3781_s18, %s3408_s23  ;;  %p3417_p7 = scmp.lt.s32.totalorder %s3408_s23, %s3408_s23 }
  0x4a   : > { %p3411_p2 = pnand %p3409_p1, %p3791_p0  ;;  %p3418_p8 = por %p3417_p7, %p3416_p4 }
  0x4c   : > { %p3412_p3 = pneg %p3411_p2 }
  0x4e   : > { %p3419_p11 = pnand %p3418_p8, %p3412_p3 }
  0x50   : > { %3422 = shalt.err (!%p3419_p11)
}
  0x51   : > { %s4660_s14 = smov 128   ;;  %s4661_s13 = smov 8  }
  0x52   : > { %3080 = dma.hbm_to_vmem [thread:$0]  (!%p3777_p12), %s4635_s10, 2048, %s3781_s18, [#allocation9], %s4660_s14, %s4660_s14, %s4661_s13  }
  0x53   : > { %s3621_s27 = smov [#allocation2]   ;;  %s3622_s20 = smov [#allocation7]  }
  0x54   : > { %s468_s0 = sshll.u32 %s3621_s27, 4  ;;  %s500_s30 = sshll.u32 %s3622_s20, 4  ;;  %s469_s0 = int_to_ptr.vmem [resolvable:$true] %s468_s0  ;;  %s3836_s30 = int_to_ptr.vmem [resolvable:$true] %s500_s30 }
  0x55   : > { %s3423_s24 = scalar_lea.hbm %s4629_s4, 2048 }
  0x56   : > { %p3424_p5 = scmp.ne.s32.totalorder %s4629_s4, %s3423_s24  ;;  %p3430_p10 = scmp.lt.u32.totalorder %s3423_s24, %s4629_s4 }
  0x58   : > { %p3426_p6 = pnand %p3424_p5, %p3791_p0 }
  0x5a   : > { %p3427_p9 = pneg %p3426_p6 }
  0x5c   : > { %p3432_p13 = pnand %p3430_p10, %p3427_p9 }
  0x5e   : > { %3435 = shalt.err (!%p3432_p13)
}
  0x5f   : > { %s3436_s1 = scalar_lea.vmem %s469_s0, 2048  ;;  %p3444_p4 = scmp.lt.s32.totalorder %s469_s0, %s469_s0 }
  0x60   : > { %p3437_p1 = scmp.ne.s32.totalorder %s469_s0, %s3436_s1  ;;  %p3445_p7 = scmp.lt.s32.totalorder %s3436_s1, %s3436_s1 }
  0x62   : > { %p3439_p2 = pnand %p3437_p1, %p3791_p0  ;;  %p3446_p8 = por %p3445_p7, %p3444_p4 }
  0x64   : > { %p3440_p3 = pneg %p3439_p2 }
  0x66   : > { %p3447_p11 = pnand %p3446_p8, %p3440_p3 }
  0x68   : > { %3450 = shalt.err (!%p3447_p11)
}
  0x69   : > { %s4681_s6 = smov 4   ;;  %s4682_s19 = smov 64  }
  0x6a   : > { %3071 = dma.hbm_to_vmem [thread:$0]  (!%p3777_p12), %s4629_s4, 2048, %s469_s0, [#allocation3], %s4682_s19, %s4682_s19, %s4681_s6  }
  0x6b   : > { %s3451_s23 = scalar_lea.hbm %s4633_s8, 512 }
  0x6c   : > { %p3452_p5 = scmp.ne.s32.totalorder %s4633_s8, %s3451_s23  ;;  %p3458_p10 = scmp.lt.u32.totalorder %s3451_s23, %s4633_s8 }
  0x6e   : > { %p3454_p6 = pnand %p3452_p5, %p3791_p0 }
  0x70   : > { %p3455_p9 = pneg %p3454_p6 }
  0x72   : > { %p3460_p13 = pnand %p3458_p10, %p3455_p9 }
  0x74   : > { %3463 = shalt.err (!%p3460_p13)
}
  0x75   : > { %s3464_s0 = scalar_lea.vmem %s3836_s30, 512  ;;  %p3472_p4 = scmp.lt.s32.totalorder %s3836_s30, %s3836_s30 }
  0x76   : > { %p3465_p1 = scmp.ne.s32.totalorder %s3836_s30, %s3464_s0  ;;  %p3473_p7 = scmp.lt.s32.totalorder %s3464_s0, %s3464_s0 }
  0x78   : > { %p3467_p2 = pnand %p3465_p1, %p3791_p0  ;;  %p3474_p8 = por %p3473_p7, %p3472_p4 }
  0x7a   : > { %p3468_p3 = pneg %p3467_p2 }
  0x7c   : > { %p3475_p11 = pnand %p3474_p8, %p3468_p3 }
  0x7e   : > { %3478 = shalt.err (!%p3475_p11)
}
  0x7f   : > { %3077 = dma.hbm_to_vmem [thread:$0]  (!%p3777_p12), %s4633_s8, 512, %s3836_s30, [#allocation6], %s4682_s19, %s4682_s19, %s4681_s6  }
  0x80   : > { %s3623_s24 = smov [#allocation10]   ;;  %s3479_s15 = scalar_lea.hbm %s4637_s12, 4096 }
  0x81   : > { %s532_s20 = sshll.u32 %s3623_s24, 4  ;;  %p3480_p5 = scmp.ne.s32.totalorder %s4637_s12, %s3479_s15  ;;  %s533_s20 = int_to_ptr.vmem [resolvable:$true] %s532_s20 }
  0x82   : > { %p3486_p10 = scmp.lt.u32.totalorder %s3479_s15, %s4637_s12 }
  0x83   : > { %p3482_p6 = pnand %p3480_p5, %p3791_p0 }
  0x85   : > { %p3483_p9 = pneg %p3482_p6 }
  0x87   : > { %p3488_p13 = pnand %p3486_p10, %p3483_p9 }
  0x89   : > { %3491 = shalt.err (!%p3488_p13)
}
  0x8a   : > { %s3492_s30 = scalar_lea.vmem %s533_s20, 4096  ;;  %p3500_p4 = scmp.lt.s32.totalorder %s533_s20, %s533_s20 }
  0x8b   : > { %p3493_p1 = scmp.ne.s32.totalorder %s533_s20, %s3492_s30  ;;  %p3501_p7 = scmp.lt.s32.totalorder %s3492_s30, %s3492_s30 }
  0x8d   : > { %p3495_p2 = pnand %p3493_p1, %p3791_p0  ;;  %p3502_p8 = por %p3501_p7, %p3500_p4 }
  0x8f   : > { %p3496_p3 = pneg %p3495_p2 }
  0x91   : > { %p3503_p11 = pnand %p3502_p8, %p3496_p3 }
  0x93   : > { %3506 = shalt.err (!%p3503_p11)
}
  0x94   : > { %s4683_s6 = smov 8   ;;  %s4684_s19 = smov 128  }
  0x95   : > { %3083 = dma.hbm_to_vmem [thread:$0]  (!%p3777_p12), %s4637_s12, 4096, %s533_s20, [#allocation9], %s4684_s19, %s4684_s19, %s4683_s6  }
  0x96   : > { %p4685_p5 = scmp.ne.s32.totalorder %s4677_s21, 0 }
  0x97   : > { %p4686_p0 = scmp.eq.s32.totalorder (!%p4685_p5), %s3741_s28, 0 }
  0x98   : > { %569 = sbr.rel (%p4685_p5) target bundleno = 1772 (0x6ec), region = 76 }
  0x9f   : > { %3580 = dma.done.wait (%p4686_p0), [#allocation3], 2048   ;;  %p4687_p6 = pmov %p4686_p0 }
  0xa0   : > { %p4688_p9 = pmov %p4686_p0 }
  0xa1   : > { %3582 = vsyncadd (%p4687_p6), [#allocation3], 4294965248 }
  0xa2   : > { %3584 = dma.done.wait (%p4688_p9), [#allocation6], 1536   ;;  %p4689_p10 = pmov %p4686_p0 }
  0xa3   : > { %p4690_p13 = pmov %p4686_p0 }
  0xa4   : > { %3586 = vsyncadd (%p4689_p10), [#allocation6], 4294965760 }
  0xa5   : > { %3588 = dma.done.wait (%p4690_p13), [#allocation9], 6144   ;;  %p4691_p12 = pmov %p4686_p0 }
  0xa6   : > { %v3624_v0 = vmov 0   ;;  %v3147_v1 = vld [vmem:[%s4627_s2 + $0x4] ss:$8 sps:$4 sm:$0xff]   ;;  %v3149_v2 = vld [vmem:[%s4627_s2] ss:$8 sps:$4 sm:$0xff]   ;;  %s2743_s19 = sshll.u32 %s3741_s28, 4  ;;  %v726_v63 = vlaneseq }
  0xa7   : > { %3590 = vsyncadd (%p4691_p12), [#allocation9], 4294961152  ;;  %848 = vmatprep.mubr.bf16.mxu0 %v3624_v0  ;;  %816 = vmatprep.subr.bf16.mxu0 %v3147_v1  ;;  %v3150_v3 = vld [vmem:[%s4627_s2 + $0x14] ss:$8 sps:$4 sm:$0xff]   ;;  %v3152_v4 = vld [vmem:[%s4627_s2 + $0x10] ss:$8 sps:$4 sm:$0xff]  }
  0xa8   : > { %817 = vmatpush1.bf16.msra.mxu0 %v3149_v2  ;;  %v3153_v5 = vld [vmem:[%s4627_s2 + $0x24] ss:$8 sps:$4 sm:$0xff]   ;;  %v3155_v6 = vld [vmem:[%s4627_s2 + $0x20] ss:$8 sps:$4 sm:$0xff]   ;;  %v3156_v7 = vld [vmem:[%s4627_s2 + $0x34] ss:$8 sps:$4 sm:$0xff]  }
  0xa9   : > { %818 = vmatprep.subr.bf16.mxu0 %v3150_v3  ;;  %v3158_v8 = vld [vmem:[%s4627_s2 + $0x30] ss:$8 sps:$4 sm:$0xff]   ;;  %p658_p1 = scmp.lt.s32.totalorder %s2743_s19, 31  ;;  %v3159_v9 = vld [vmem:[%s4627_s2 + $0x44] ss:$8 sps:$4 sm:$0xff]   ;;  %s4692_s29 = sld [smem:[#allocation26_spill]] }
  0xaa   : > { %v3161_v10 = vld [vmem:[%s4627_s2 + $0x40] ss:$8 sps:$4 sm:$0xff]   ;;  %v3162_v11 = vld [vmem:[%s4627_s2 + $0x54] ss:$8 sps:$4 sm:$0xff]   ;;  %v3164_v13 = vld [vmem:[%s4627_s2 + $0x50] ss:$8 sps:$4 sm:$0xff]  }
  0xab   : > { %s4709_s19 = smov (!%p658_p1, %s2743_s19), 31  ;;  %v3171_v12 = vld [vmem:[#allocation2 + $0x40] sm:$0xff]   ;;  %v3173_v16 = vld [vmem:[#allocation2 + $0x48] sm:$0xff]   ;;  %v3175_v18 = vld [vmem:[#allocation2 + $0x50] sm:$0xff]   ;;  %v727_v1 = vshrl.u32 %v726_v63, 7  ;;  %vm1608_vm0 = vcmask 523264  }
  0xac   : > { %819 = vmatpush1.bf16.msra.mxu0 %v3152_v4  ;;  %v3172_v14 = vld [vmem:[#allocation2] sm:$0xff]   ;;  %2864 = vmatprep.subr.bf16.mxu1 %v3171_v12  ;;  %s3961_s1 = sshll.u32 %s4709_s19, 3  ;;  %v3174_v17 = vld [vmem:[#allocation2 + $0x8] sm:$0xff]   ;;  %v3168_v20 = vld [vmem:[%s4627_s2 + $0x74] ss:$8 sps:$4 sm:$0xff]   ;;  %s3625_s13 = smov 64  }
  0xad   : > { %820 = vmatprep.subr.bf16.mxu0 %v3153_v5  ;;  %v3165_v15 = vld [vmem:[%s4627_s2 + $0x64] ss:$8 sps:$4 sm:$0xff]   ;;  %2865 = vmatpush3.bf16.msra.mxu1 %v3172_v14  ;;  %v3167_v19 = vld [vmem:[%s4627_s2 + $0x60] ss:$8 sps:$4 sm:$0xff]   ;;  %v3176_v21 = vld [vmem:[#allocation2 + $0x10] sm:$0xff]   ;;  %v4001_v2 = vsub.s32 0, %v727_v1  ;;  %s4077_s6 = scalar_lea.vmem %s4641_s16, %s3961_s1  ;;  %s4285_s24 = scalar_lea.vmem %s4642_s17, %s3961_s1 }
  0xae   : > { %2866 = vmatprep.subr.bf16.mxu1 %v3173_v16  ;;  %v3177_v22 = vld [vmem:[#allocation2 + $0x58] sm:$0xff]   ;;  %v3179_v27 = vld [vmem:[#allocation2 + $0x60] sm:$0xff]   ;;  %v3181_v30 = vld [vmem:[#allocation2 + $0x68] sm:$0xff]   ;;  %v4006_v4 = vsub.s32 1, %v727_v1  ;;  %s4457_s15 = sand.u32 1, %s3605_s25   ;;  %s4694_s30 = sld [smem:[#allocation29_spill]] }
  0xaf   : > { %s3973_s22 = scalar_lea.vmem %s4692_s29, %s3961_s1  ;;  %v3170_v23 = vld [vmem:[%s4627_s2 + $0x70] ss:$8 sps:$4 sm:$0xff]   ;;  %v3180_v28 = vld [vmem:[#allocation2 + $0x20] sm:$0xff]   ;;  %v3182_v52 = vld [vmem:[#allocation2 + $0x28] sm:$0xff]   ;;  %s4693_s29 = sld [smem:[#allocation27_spill]] }
  0xb0   : > { %821 = vmatpush1.bf16.msra.mxu0 %v3155_v6  ;;  %v684_v24 = vld [vmem:[%s3973_s22] sm:$0xff]  ;;  %v685_v25 = vld [vmem:[%s3973_s22 + $0x8] sm:$0xff]  ;;  %v3178_v26 = vld [vmem:[#allocation2 + $0x18] sm:$0xff]   ;;  %s2862_s21 = sshll.u32 %s3741_s28, 11  ;;  %s4695_s19 = sld [smem:[#allocation24_spill]] }
  0xb1   : > { %822 = vmatprep.subr.bf16.mxu0 %v3156_v7  ;;  %2867 = vmatpush3.bf16.msra.mxu1 %v3174_v17  ;;  %v700_v29 = vpack.c.bf16 %v685_v25, %v684_v24  ;;  %v686_v31 = vld [vmem:[%s3973_s22 + $0x10] sm:$0xff]  ;;  %v687_v32 = vld [vmem:[%s3973_s22 + $0x18] sm:$0xff]  ;;  %v688_v34 = vld [vmem:[%s3973_s22 + $0x20] sm:$0xff]  ;;  %s4697_s23 = sld [smem:[#allocation31_spill]]  ;;  %s2469_s0 = scalar_lea.sflag [#allocation4], %s4457_s15 }
  0xb2   : > { %2868 = vmatprep.subr.bf16.mxu1 %v3175_v18  ;;  %v701_v33 = vpack.c.bf16 %v687_v32, %v686_v31  ;;  %v689_v35 = vld [vmem:[%s3973_s22 + $0x28] sm:$0xff]  ;;  %v690_v37 = vld [vmem:[%s3973_s22 + $0x30] sm:$0xff]  ;;  %v691_v38 = vld [vmem:[%s3973_s22 + $0x38] sm:$0xff] }
  0xb3   : > { %v702_v36 = vpack.c.bf16 %v689_v35, %v688_v34  ;;  %v703_v39 = vpack.c.bf16 %v691_v38, %v690_v37  ;;  %v692_v40 = vld [vmem:[%s3973_s22 + $0x40] sm:$0xff]  ;;  %v693_v41 = vld [vmem:[%s3973_s22 + $0x48] sm:$0xff]  ;;  %v694_v43 = vld [vmem:[%s3973_s22 + $0x50] sm:$0xff] }
  0xb4   : > { %823 = vmatpush1.bf16.msra.mxu0 %v3158_v8  ;;  %v704_v42 = vpack.c.bf16 %v693_v41, %v692_v40  ;;  %v695_v44 = vld [vmem:[%s3973_s22 + $0x58] sm:$0xff]  ;;  %v696_v46 = vld [vmem:[%s3973_s22 + $0x60] sm:$0xff]  ;;  %v697_v47 = vld [vmem:[%s3973_s22 + $0x68] sm:$0xff] }
  0xb5   : > { %824 = vmatprep.subr.bf16.mxu0 %v3159_v9  ;;  %2869 = vmatpush3.bf16.msra.mxu1 %v3176_v21  ;;  %v705_v45 = vpack.c.bf16 %v695_v44, %v694_v43  ;;  %v706_v48 = vpack.c.bf16 %v697_v47, %v696_v46  ;;  %v698_v49 = vld [vmem:[%s3973_s22 + $0x70] sm:$0xff]  ;;  %v699_v50 = vld [vmem:[%s3973_s22 + $0x78] sm:$0xff]  ;;  %v3187_v57 = vld [vmem:[#allocation5] sm:$0xff]   ;;  %s4243_s22 = scalar_lea.vmem %s4693_s29, %s3961_s1  ;;  %s4696_s1 = sld [smem:[#allocation30_spill]] }
  0xb6   : > { %2870 = vmatprep.subr.bf16.mxu1 %v3177_v22  ;;  %v707_v51 = vpack.c.bf16 %v699_v50, %v698_v49  ;;  %v3183_v53 = vld [vmem:[#allocation2 + $0x70] sm:$0xff]   ;;  %v3185_v55 = vld [vmem:[#allocation2 + $0x78] sm:$0xff]   ;;  %v3188_v58 = vld [vmem:[#allocation5 + $0x8] sm:$0xff]   ;;  %p4698_p3 = scmp.ne.s32.totalorder %s4695_s19, 0 }
  0xb7   : > { %v3184_v54 = vld [vmem:[#allocation2 + $0x30] sm:$0xff]   ;;  %v3186_v56 = vld [vmem:[#allocation2 + $0x38] sm:$0xff]   ;;  %v3191_v61 = vld [vmem:[#allocation5 + $0x20] sm:$0xff]   ;;  %s4548_s18 = scalar_lea.hbm %s4697_s23, %s2862_s21 }
  0xb8   : > { %825 = vmatpush1.bf16.msra.mxu0 %v3161_v10  ;;  %v3189_v59 = vld [vmem:[#allocation5 + $0x10] sm:$0xff]   ;;  %v3190_v60 = vld [vmem:[#allocation5 + $0x18] sm:$0xff]   ;;  %v3192_v62 = vld [vmem:[#allocation5 + $0x28] sm:$0xff]  }
  0xb9   : > { %826 = vmatprep.subr.bf16.mxu0 %v3162_v11  ;;  %2871 = vmatpush3.bf16.msra.mxu1 %v3178_v26  ;;  %v724_v3 = vld [vmem:[%s4628_s3] sm:$0x3] }
  0xba   : > { %2872 = vmatprep.subr.bf16.mxu1 %v3179_v27  ;;  %v4009_v5 = vrot.slane %v724_v3, %v4001_v2  ;;  %v4012_v6 = vrot.slane %v724_v3, %v4006_v4 }
  0xbb   : > { %s4537_s20 = scalar_lea.hbm %s4696_s1, %s2862_s21 }
  0xbc   : > { %827 = vmatpush1.bf16.msra.mxu0 %v3164_v13 }
  0xbd   : > { %828 = vmatprep.subr.bf16.mxu0 %v3165_v15  ;;  %2873 = vmatpush3.bf16.msra.mxu1 %v3180_v28 }
  0xbe   : > { %2874 = vmatprep.subr.bf16.mxu1 %v3181_v30 }
  0xc0   : > { %829 = vmatpush1.bf16.msra.mxu0 %v3167_v19 }
  0xc1   : > { %830 = vmatprep.subr.bf16.mxu0 %v3168_v20  ;;  %2875 = vmatpush3.bf16.msra.mxu1 %v3182_v52 }
  0xc2   : > { %2876 = vmatprep.subr.bf16.mxu1 %v3183_v53 }
  0xc4   : > { %831 = vmatpush1.bf16.msra.mxu0 %v3170_v23 }
  0xc5   : > { %2877 = vmatpush3.bf16.msra.mxu1 %v3184_v54  ;;  %2956 = vmatprep.subr.bf16.mxu0 %v3187_v57 }
  0xc6   : > { %2878 = vmatprep.subr.bf16.mxu1 %v3185_v55 }
  0xc7   : > { %849 = vmatmul.mubr.bf16.vlgmr.msra.gmra.mrb[0].mxu0 %v700_v29 }
  0xc8   : > { %858 = vmatprep.mubr.bf16.mxu0 %v3624_v0  ;;  %2957 = vmatpush3.bf16.msra.mxu0 %v3187_v57 }
  0xc9   : > { %2879 = vmatpush3.bf16.msra.mxu1 %v3186_v56  ;;  %2958 = vmatprep.subr.bf16.mxu0 %v3188_v58 }
  0xcc   : > { %2959 = vmatpush3.bf16.msra.mxu0 %v3188_v58 }
  0xcd   : > { %2960 = vmatprep.subr.bf16.mxu0 %v3189_v59 }
  0xcf   : > { %859 = vmatmul.mubr.bf16.gmra.mrb[4].mxu0 %v701_v33 }
  0xd0   : > { %868 = vmatprep.mubr.bf16.mxu0 %v3624_v0  ;;  %2961 = vmatpush3.bf16.msra.mxu0 %v3189_v59 }
  0xd1   : > { %2962 = vmatprep.subr.bf16.mxu0 %v3190_v60 }
  0xd4   : > { %2963 = vmatpush3.bf16.msra.mxu0 %v3190_v60 }
  0xd5   : > { %2964 = vmatprep.subr.bf16.mxu0 %v3191_v61 }
  0xd7   : > { %869 = vmatmul.mubr.bf16.gmra.mrb[8].mxu0 %v702_v36 }
  0xd8   : > { %878 = vmatprep.mubr.bf16.mxu0 %v3624_v0  ;;  %2965 = vmatpush3.bf16.msra.mxu0 %v3191_v61 }
  0xd9   : > { %2966 = vmatprep.subr.bf16.mxu0 %v3192_v62 }
  0xdc   : > { %2967 = vmatpush3.bf16.msra.mxu0 %v3192_v62 }
  0xdf   : > { %879 = vmatmul.mubr.bf16.gmra.mrb[12].mxu0 %v703_v39 }
  0xe0   : > { %888 = vmatprep.mubr.bf16.mxu0 %v3624_v0 }
  0xe7   : > { %889 = vmatmul.mubr.bf16.gmra.mrb[16].mxu0 %v704_v42 }
  0xe8   : > { %898 = vmatprep.mubr.bf16.mxu0 %v3624_v0 }
  0xef   : > { %899 = vmatmul.mubr.bf16.gmra.mrb[20].mxu0 %v705_v45 }
  0xf0   : > { %908 = vmatprep.mubr.bf16.mxu0 %v3624_v0 }
  0xf7   : > { %909 = vmatmul.mubr.bf16.gmra.mrb[24].mxu0 %v706_v48 }
  0xf8   : > { %918 = vmatprep.mubr.bf16.mxu0 %v3624_v0 }
  0xff   : > { %919 = vmatmul.mubr.bf16.gmra.mrb[28].mxu0 %v707_v51 }
 0x19a   : > { %v850_v7 = vpop.f32.mrb[0].mxu0 }
 0x19b   : > { %v851_v8 = vadd.f32 %v850_v7, %v4009_v5  ;;  %v852_v9 = vpop.f32.mrb[1].mxu0 }
 0x19c   : > { %v853_v10 = vadd.f32 %v852_v9, %v4012_v6  ;;  %v854_v11 = vpop.f32.mrb[2].mxu0 }
 0x19d   : > { %v855_v12 = vadd.f32 %v854_v11, %v4009_v5  ;;  %v856_v13 = vpop.f32.mrb[3].mxu0  ;;  %v929_v15 = vmax.f32 %v851_v8, 0.0 }
 0x19e   : > { %v857_v14 = vadd.f32 %v856_v13, %v4012_v6  ;;  %v930_v17 = vmax.f32 %v853_v10, 0.0 }
 0x19f   : > { %v931_v16 = vmax.f32 %v855_v12, 0.0 }
 0x1a0   : > { %v932_v18 = vmax.f32 %v857_v14, 0.0 }
 0x1a1   : > { %v961_v19 = vpack.c.bf16 %v931_v16, %v929_v15 }
 0x1a2   : > { %v860_v20 = vpop.f32.mrb[4].mxu0  ;;  %v962_v21 = vpack.c.bf16 %v932_v18, %v930_v17 }
 0x1a3   : > { %v861_v22 = vadd.f32 %v860_v20, %v4009_v5  ;;  %v862_v23 = vpop.f32.mrb[5].mxu0 }
 0x1a4   : > { %v863_v24 = vadd.f32 %v862_v23, %v4012_v6  ;;  %v864_v25 = vpop.f32.mrb[6].mxu0  ;;  %1144 = vmatprep.mubr.bf16.mxu1 %v962_v21 }
 0x1a5   : > { %v865_v26 = vadd.f32 %v864_v25, %v4009_v5  ;;  %v866_v27 = vpop.f32.mrb[7].mxu0  ;;  %1145 = vmatmul.mubr.bf16.vlgmr.msra.gmra.mrb[0].mxu1 %v961_v19  ;;  %v933_v29 = vmax.f32 %v861_v22, 0.0 }
 0x1a6   : > { %v867_v28 = vadd.f32 %v866_v27, %v4012_v6  ;;  %v934_v31 = vmax.f32 %v863_v24, 0.0 }
 0x1a7   : > { %v935_v30 = vmax.f32 %v865_v26, 0.0 }
 0x1a8   : > { %v936_v32 = vmax.f32 %v867_v28, 0.0 }
 0x1a9   : > { %v963_v33 = vpack.c.bf16 %v935_v30, %v933_v29 }
 0x1aa   : > { %v964_v34 = vpack.c.bf16 %v936_v32, %v934_v31  ;;  %v870_v35 = vpop.f32.mrb[8].mxu0 }
 0x1ab   : > { %v871_v36 = vadd.f32 %v870_v35, %v4009_v5  ;;  %v872_v37 = vpop.f32.mrb[9].mxu0 }
 0x1ac   : > { %v873_v38 = vadd.f32 %v872_v37, %v4012_v6  ;;  %v874_v39 = vpop.f32.mrb[10].mxu0  ;;  %1152 = vmatprep.mubr.bf16.mxu1 %v964_v34 }
 0x1ad   : > { %v875_v40 = vadd.f32 %v874_v39, %v4009_v5  ;;  %v876_v41 = vpop.f32.mrb[11].mxu0  ;;  %1153 = vmatmul.mubr.bf16.gmra.mrb[4].mxu1 %v963_v33  ;;  %v937_v43 = vmax.f32 %v871_v36, 0.0 }
 0x1ae   : > { %v877_v42 = vadd.f32 %v876_v41, %v4012_v6  ;;  %v938_v45 = vmax.f32 %v873_v38, 0.0 }
 0x1af   : > { %v939_v44 = vmax.f32 %v875_v40, 0.0 }
 0x1b0   : > { %v940_v46 = vmax.f32 %v877_v42, 0.0 }
 0x1b1   : > { %v965_v47 = vpack.c.bf16 %v939_v44, %v937_v43 }
 0x1b2   : > { %v966_v48 = vpack.c.bf16 %v940_v46, %v938_v45  ;;  %v880_v49 = vpop.f32.mrb[12].mxu0 }
 0x1b3   : > { %v881_v50 = vadd.f32 %v880_v49, %v4009_v5  ;;  %v882_v51 = vpop.f32.mrb[13].mxu0 }
 0x1b4   : > { %v883_v52 = vadd.f32 %v882_v51, %v4012_v6  ;;  %v884_v53 = vpop.f32.mrb[14].mxu0  ;;  %1160 = vmatprep.mubr.bf16.mxu1 %v966_v48 }
 0x1b5   : > { %v885_v54 = vadd.f32 %v884_v53, %v4009_v5  ;;  %v886_v55 = vpop.f32.mrb[15].mxu0  ;;  %1161 = vmatmul.mubr.bf16.gmra.mrb[8].mxu1 %v965_v47  ;;  %v941_v57 = vmax.f32 %v881_v50, 0.0 }
 0x1b6   : > { %v887_v56 = vadd.f32 %v886_v55, %v4012_v6  ;;  %v942_v59 = vmax.f32 %v883_v52, 0.0 }
 0x1b7   : > { %v943_v58 = vmax.f32 %v885_v54, 0.0 }
 0x1b8   : > { %v944_v60 = vmax.f32 %v887_v56, 0.0 }
 0x1b9   : > { %v967_v61 = vpack.c.bf16 %v943_v58, %v941_v57 }
 0x1ba   : > { %v968_v62 = vpack.c.bf16 %v944_v60, %v942_v59  ;;  %v890_v63 = vpop.f32.mrb[16].mxu0  ;;  %v3193_v60 = vld [vmem:[#allocation5 + $0x30] sm:$0xff]  }
 0x1bb   : > { %v891_v1 = vadd.f32 %v890_v63, %v4009_v5  ;;  %v892_v3 = vpop.f32.mrb[17].mxu0  ;;  %2968 = vmatprep.subr.bf16.mxu0 %v3193_v60 }
 0x1bc   : > { %v893_v7 = vadd.f32 %v892_v3, %v4012_v6  ;;  %v894_v8 = vpop.f32.mrb[18].mxu0  ;;  %1168 = vmatprep.mubr.bf16.mxu1 %v968_v62  ;;  %2969 = vmatpush3.bf16.msra.mxu0 %v3193_v60 }
 0x1bd   : > { %v895_v9 = vadd.f32 %v894_v8, %v4009_v5  ;;  %v896_v10 = vpop.f32.mrb[19].mxu0  ;;  %1169 = vmatmul.mubr.bf16.gmra.mrb[12].mxu1 %v967_v61  ;;  %v945_v12 = vmax.f32 %v891_v1, 0.0  ;;  %v3194_v61 = vld [vmem:[#allocation5 + $0x38] sm:$0xff]  }
 0x1be   : > { %v897_v11 = vadd.f32 %v896_v10, %v4012_v6  ;;  %v946_v14 = vmax.f32 %v893_v7, 0.0  ;;  %2970 = vmatprep.subr.bf16.mxu0 %v3194_v61 }
 0x1bf   : > { %v947_v13 = vmax.f32 %v895_v9, 0.0 }
 0x1c0   : > { %v948_v15 = vmax.f32 %v897_v11, 0.0  ;;  %2971 = vmatpush3.bf16.msra.mxu0 %v3194_v61 }
 0x1c1   : > { %v969_v16 = vpack.c.bf16 %v947_v13, %v945_v12 }
 0x1c2   : > { %v970_v17 = vpack.c.bf16 %v948_v15, %v946_v14  ;;  %v900_v18 = vpop.f32.mrb[20].mxu0 }
 0x1c3   : > { %v901_v19 = vadd.f32 %v900_v18, %v4009_v5  ;;  %v902_v20 = vpop.f32.mrb[21].mxu0 }
 0x1c4   : > { %v903_v21 = vadd.f32 %v902_v20, %v4012_v6  ;;  %v904_v22 = vpop.f32.mrb[22].mxu0  ;;  %1176 = vmatprep.mubr.bf16.mxu1 %v970_v17 }
 0x1c5   : > { %v905_v23 = vadd.f32 %v904_v22, %v4009_v5  ;;  %v906_v24 = vpop.f32.mrb[23].mxu0  ;;  %1177 = vmatmul.mubr.bf16.gmra.mrb[16].mxu1 %v969_v16  ;;  %v949_v26 = vmax.f32 %v901_v19, 0.0 }
 0x1c6   : > { %v907_v25 = vadd.f32 %v906_v24, %v4012_v6  ;;  %v950_v28 = vmax.f32 %v903_v21, 0.0 }
 0x1c7   : > { %v951_v27 = vmax.f32 %v905_v23, 0.0 }
 0x1c8   : > { %v952_v29 = vmax.f32 %v907_v25, 0.0 }
 0x1c9   : > { %v971_v30 = vpack.c.bf16 %v951_v27, %v949_v26 }
 0x1ca   : > { %v972_v31 = vpack.c.bf16 %v952_v29, %v950_v28  ;;  %v910_v32 = vpop.f32.mrb[24].mxu0 }
 0x1cb   : > { %v911_v33 = vadd.f32 %v910_v32, %v4009_v5  ;;  %v912_v34 = vpop.f32.mrb[25].mxu0 }
 0x1cc   : > { %v913_v35 = vadd.f32 %v912_v34, %v4012_v6  ;;  %v914_v36 = vpop.f32.mrb[26].mxu0  ;;  %1184 = vmatprep.mubr.bf16.mxu1 %v972_v31 }
 0x1cd   : > { %v915_v37 = vadd.f32 %v914_v36, %v4009_v5  ;;  %v916_v38 = vpop.f32.mrb[27].mxu0  ;;  %1185 = vmatmul.mubr.bf16.gmra.mrb[20].mxu1 %v971_v30  ;;  %v953_v40 = vmax.f32 %v911_v33, 0.0 }
 0x1ce   : > { %v917_v39 = vadd.f32 %v916_v38, %v4012_v6  ;;  %v954_v42 = vmax.f32 %v913_v35, 0.0 }
 0x1cf   : > { %v955_v41 = vmax.f32 %v915_v37, 0.0 }
 0x1d0   : > { %v956_v43 = vmax.f32 %v917_v39, 0.0 }
 0x1d1   : > { %v973_v44 = vpack.c.bf16 %v955_v41, %v953_v40 }
 0x1d2   : > { %v974_v45 = vpack.c.bf16 %v956_v43, %v954_v42  ;;  %v920_v46 = vpop.f32.mrb[28].mxu0 }
 0x1d3   : > { %v921_v47 = vadd.f32 %v920_v46, %v4009_v5  ;;  %v922_v48 = vpop.f32.mrb[29].mxu0 }
 0x1d4   : > { %v923_v49 = vadd.f32 %v922_v48, %v4012_v6  ;;  %v924_v50 = vpop.f32.mrb[30].mxu0  ;;  %1192 = vmatprep.mubr.bf16.mxu1 %v974_v45 }
 0x1d5   : > { %v925_v51 = vadd.f32 %v924_v50, %v4009_v5  ;;  %v926_v52 = vpop.f32.mrb[31].mxu0  ;;  %1193 = vmatmul.mubr.bf16.gmra.mrb[24].mxu1 %v973_v44  ;;  %v957_v54 = vmax.f32 %v921_v47, 0.0  ;;  %v4049_v5 = vld [vmem:[%s4630_s5] ss:$0 sm:$0xff] }
 0x1d6   : > { %v927_v53 = vadd.f32 %v926_v52, %v4012_v6  ;;  %v958_v56 = vmax.f32 %v923_v49, 0.0 }
 0x1d7   : > { %v959_v55 = vmax.f32 %v925_v51, 0.0 }
 0x1d8   : > { %v960_v57 = vmax.f32 %v927_v53, 0.0 }
 0x1d9   : > { %v975_v58 = vpack.c.bf16 %v959_v55, %v957_v54 }
 0x1da   : > { %v976_v59 = vpack.c.bf16 %v960_v57, %v958_v56 }
 0x1dc   : > { %1200 = vmatprep.mubr.bf16.mxu1 %v976_v59 }
 0x1dd   : > { %1201 = vmatmul.mubr.bf16.gmra.mrb[28].mxu1 %v975_v58 }
 0x278   : > { %v2880_v62 = vpop.f32.mrb[0].mxu1 }
 0x279   : > { %v2881_v6 = vpop.f32.mrb[1].mxu1 }
 0x27a   : > { %v2882_v63 = vadd.f32 %v2881_v6, %v2880_v62  ;;  %v2883_v1 = vpop.f32.mrb[2].mxu1 }
 0x27b   : > { %v2884_v3 = vpop.f32.mrb[3].mxu1 }
 0x27c   : > { %v1147_v7 = vadd.f32 %v2882_v63, %v4049_v5  ;;  %v2885_v8 = vadd.f32 %v2884_v3, %v2883_v1 }
 0x27e   : > { %v1150_v9 = vadd.f32 %v2885_v8, %v4049_v5  ;;  %v1209_v10 = vmax.f32 %v1147_v7, 0.0 }
 0x280   : > { %v1210_v11 = vmax.f32 %v1150_v9, 0.0  ;;  %v2886_v12 = vpop.f32.mrb[4].mxu1 }
 0x281   : > { %v2887_v13 = vpop.f32.mrb[5].mxu1 }
 0x282   : > { %v2888_v14 = vadd.f32 %v2887_v13, %v2886_v12  ;;  %v2889_v15 = vpop.f32.mrb[6].mxu1  ;;  %v1225_v16 = vpack.c.bf16 %v1210_v11, %v1209_v10 }
 0x283   : > { %v2890_v17 = vpop.f32.mrb[7].mxu1 }
 0x284   : > { %v1155_v18 = vadd.f32 %v2888_v14, %v4049_v5  ;;  %v2891_v19 = vadd.f32 %v2890_v17, %v2889_v15  ;;  %2972 = vmatprep.mubr.bf16.mxu0 %v1225_v16 }
 0x286   : > { %v1158_v20 = vadd.f32 %v2891_v19, %v4049_v5  ;;  %v1211_v21 = vmax.f32 %v1155_v18, 0.0 }
 0x288   : > { %v1212_v22 = vmax.f32 %v1158_v20, 0.0  ;;  %v2892_v23 = vpop.f32.mrb[8].mxu1 }
 0x289   : > { %v2893_v24 = vpop.f32.mrb[9].mxu1 }
 0x28a   : > { %v1226_v25 = vpack.c.bf16 %v1212_v22, %v1211_v21  ;;  %v2894_v26 = vadd.f32 %v2893_v24, %v2892_v23  ;;  %v2895_v27 = vpop.f32.mrb[10].mxu1 }
 0x28b   : > { %v2896_v28 = vpop.f32.mrb[11].mxu1 }
 0x28c   : > { %v1163_v29 = vadd.f32 %v2894_v26, %v4049_v5  ;;  %v2897_v30 = vadd.f32 %v2896_v28, %v2895_v27  ;;  %2973 = vmatmul.mubr.bf16.vlgmr.msra.gmra.mrb[32].mxu0 %v1226_v25 }
 0x28e   : > { %v1166_v31 = vadd.f32 %v2897_v30, %v4049_v5  ;;  %v1213_v32 = vmax.f32 %v1163_v29, 0.0  ;;  %v3195_v30 = vld [vmem:[#allocation7] sm:$0xff]  }
 0x28f   : > { %2988 = vmatprep.subr.bf16.mxu1 %v3195_v30 }
 0x290   : > { %v1214_v33 = vmax.f32 %v1166_v31, 0.0  ;;  %v2898_v34 = vpop.f32.mrb[12].mxu1  ;;  %2989 = vmatpush3.bf16.msra.mxu1 %v3195_v30  ;;  %v3196_v31 = vld [vmem:[#allocation7 + $0x8] sm:$0xff]  }
 0x291   : > { %v2899_v35 = vpop.f32.mrb[13].mxu1  ;;  %2990 = vmatprep.subr.bf16.mxu1 %v3196_v31 }
 0x292   : > { %v2900_v36 = vadd.f32 %v2899_v35, %v2898_v34  ;;  %v2901_v37 = vpop.f32.mrb[14].mxu1  ;;  %v1227_v38 = vpack.c.bf16 %v1214_v33, %v1213_v32  ;;  %v3197_v32 = vld [vmem:[#allocation7 + $0x10] sm:$0xff]   ;;  %v3198_v33 = vld [vmem:[#allocation7 + $0x18] sm:$0xff]  }
 0x293   : > { %v2902_v39 = vpop.f32.mrb[15].mxu1 }
 0x294   : > { %v1171_v40 = vadd.f32 %v2900_v36, %v4049_v5  ;;  %v2903_v41 = vadd.f32 %v2902_v39, %v2901_v37  ;;  %2976 = vmatprep.mubr.bf16.mxu0 %v1227_v38  ;;  %2991 = vmatpush3.bf16.msra.mxu1 %v3196_v31 }
 0x295   : > { %2992 = vmatprep.subr.bf16.mxu1 %v3197_v32 }
 0x296   : > { %v1174_v42 = vadd.f32 %v2903_v41, %v4049_v5  ;;  %v1215_v43 = vmax.f32 %v1171_v40, 0.0 }
 0x298   : > { %v1216_v44 = vmax.f32 %v1174_v42, 0.0  ;;  %v2904_v45 = vpop.f32.mrb[16].mxu1  ;;  %2993 = vmatpush3.bf16.msra.mxu1 %v3197_v32 }
 0x299   : > { %v2905_v46 = vpop.f32.mrb[17].mxu1  ;;  %2994 = vmatprep.subr.bf16.mxu1 %v3198_v33 }
 0x29a   : > { %v2906_v47 = vadd.f32 %v2905_v46, %v2904_v45  ;;  %v2907_v48 = vpop.f32.mrb[18].mxu1  ;;  %v1228_v49 = vpack.c.bf16 %v1216_v44, %v1215_v43 }
 0x29b   : > { %v2908_v50 = vpop.f32.mrb[19].mxu1 }
 0x29c   : > { %v1179_v51 = vadd.f32 %v2906_v47, %v4049_v5  ;;  %v2909_v52 = vadd.f32 %v2908_v50, %v2907_v48  ;;  %2977 = vmatmul.mubr.bf16.gmra.mrb[36].mxu0 %v1228_v49  ;;  %2995 = vmatpush3.bf16.msra.mxu1 %v3198_v33 }
 0x29e   : > { %v1182_v53 = vadd.f32 %v2909_v52, %v4049_v5  ;;  %v1217_v54 = vmax.f32 %v1179_v51, 0.0 }
 0x2a0   : > { %v1218_v55 = vmax.f32 %v1182_v53, 0.0  ;;  %v2910_v56 = vpop.f32.mrb[20].mxu1 }
 0x2a1   : > { %v2911_v57 = vpop.f32.mrb[21].mxu1 }
 0x2a2   : > { %v2912_v58 = vadd.f32 %v2911_v57, %v2910_v56  ;;  %v2913_v59 = vpop.f32.mrb[22].mxu1  ;;  %v1229_v60 = vpack.c.bf16 %v1218_v55, %v1217_v54 }
 0x2a3   : > { %v2914_v61 = vpop.f32.mrb[23].mxu1 }
 0x2a4   : > { %v1187_v62 = vadd.f32 %v2912_v58, %v4049_v5  ;;  %v2915_v6 = vadd.f32 %v2914_v61, %v2913_v59  ;;  %2980 = vmatprep.mubr.bf16.mxu0 %v1229_v60 }
 0x2a6   : > { %v1190_v63 = vadd.f32 %v2915_v6, %v4049_v5  ;;  %v1219_v1 = vmax.f32 %v1187_v62, 0.0 }
 0x2a8   : > { %v1220_v3 = vmax.f32 %v1190_v63, 0.0  ;;  %v2916_v7 = vpop.f32.mrb[24].mxu1 }
 0x2a9   : > { %v2917_v8 = vpop.f32.mrb[25].mxu1 }
 0x2aa   : > { %v2918_v9 = vadd.f32 %v2917_v8, %v2916_v7  ;;  %v2919_v10 = vpop.f32.mrb[26].mxu1  ;;  %v1230_v11 = vpack.c.bf16 %v1220_v3, %v1219_v1 }
 0x2ab   : > { %v2920_v12 = vpop.f32.mrb[27].mxu1 }
 0x2ac   : > { %v1195_v13 = vadd.f32 %v2918_v9, %v4049_v5  ;;  %v2921_v14 = vadd.f32 %v2920_v12, %v2919_v10  ;;  %2981 = vmatmul.mubr.bf16.gmra.mrb[40].mxu0 %v1230_v11 }
 0x2ae   : > { %v1198_v15 = vadd.f32 %v2921_v14, %v4049_v5  ;;  %v1221_v16 = vmax.f32 %v1195_v13, 0.0 }
 0x2b0   : > { %v1222_v17 = vmax.f32 %v1198_v15, 0.0  ;;  %v2922_v18 = vpop.f32.mrb[28].mxu1 }
 0x2b1   : > { %v2923_v19 = vpop.f32.mrb[29].mxu1 }
 0x2b2   : > { %v2924_v20 = vadd.f32 %v2923_v19, %v2922_v18  ;;  %v2925_v21 = vpop.f32.mrb[30].mxu1  ;;  %v1231_v22 = vpack.c.bf16 %v1222_v17, %v1221_v16 }
 0x2b3   : > { %v2926_v23 = vpop.f32.mrb[31].mxu1 }
 0x2b4   : > { %v1203_v24 = vadd.f32 %v2924_v20, %v4049_v5  ;;  %v2927_v25 = vadd.f32 %v2926_v23, %v2925_v21  ;;  %2984 = vmatprep.mubr.bf16.mxu0 %v1231_v22 }
 0x2b6   : > { %v1206_v26 = vadd.f32 %v2927_v25, %v4049_v5  ;;  %v1223_v27 = vmax.f32 %v1203_v24, 0.0  ;;  %v4071_v5 = vld [vmem:[%s4632_s7] ss:$0 sm:$0xff] }
 0x2b8   : > { %v1224_v28 = vmax.f32 %v1206_v26, 0.0 }
 0x2ba   : > { %v1232_v29 = vpack.c.bf16 %v1224_v28, %v1223_v27 }
 0x2bc   : > { %2985 = vmatmul.mubr.bf16.gmra.mrb[44].mxu0 %v1232_v29 }
 0x2bd   : > { %1894 = vmatprep.mubr.bf16.mxu0 %v3624_v0 }
 0x35f   : > { %v2974_v34 = vpop.f32.mrb[32].mxu0 }
 0x360   : > { %v4080_v35 = vadd.f32 %v2974_v34, %v4071_v5  ;;  %v1338_v36 = vpop.f32.mrb[33].mxu0 }
 0x361   : > { %v4083_v37 = vadd.f32 %v4071_v5, %v1338_v36  ;;  %v2975_v38 = vpop.f32.mrb[34].mxu0 }
 0x362   : > { %v1419_v39 = vmul.f32 0.5, %v4080_v35  ;;  %2374 = vst.msk [vmem:[%s4077_s6 + $0x10] sm:$0xff] %vm1608_vm0, %v4080_v35  ;;  %v4090_v40 = vadd.f32 %v2975_v38, %v4071_v5  ;;  %v1341_v41 = vpop.f32.mrb[35].mxu0 }
 0x363   : > { %v1417_v42 = vmul.f32 0.5, %v4083_v37  ;;  %2372 = vst.msk [vmem:[%s4077_s6] sm:$0xff] %vm1608_vm0, %v4083_v37  ;;  %v4097_v43 = vadd.f32 %v4071_v5, %v1341_v41 }
 0x364   : > { %v1437_v44 = vmul.f32 1.442695, %v1419_v39  ;;  %v1420_v45 = vmul.f32 0.5, %v4090_v40  ;;  %2375 = vst.msk [vmem:[%s4077_s6 + $0x18] sm:$0xff] %vm1608_vm0, %v4090_v40 }
 0x365   : > { %v1433_v46 = vmul.f32 1.442695, %v1417_v42  ;;  %v1418_v47 = vmul.f32 0.5, %v4097_v43  ;;  %2373 = vst.msk [vmem:[%s4077_s6 + $0x8] sm:$0xff] %vm1608_vm0, %v4097_v43 }
 0x366   : > { %3271 = vpow2.f32 %v1437_v44  ;;  %v1439_v48 = vmul.f32 1.442695, %v1420_v45 }
 0x367   : > { %3273 = vpow2.f32 %v1433_v46  ;;  %v1435_v49 = vmul.f32 1.442695, %v1418_v47 }
 0x368   : > { %3275 = vpow2.f32 %v1439_v48 }
 0x369   : > { %3277 = vpow2.f32 %v1435_v49 }
 0x36f   : > { %v2978_v50 = vpop.f32.mrb[36].mxu0 }
 0x370   : > { %v3272_v51 = vpop.eup %3271  ;;  %v4108_v52 = vadd.f32 %v2978_v50, %v4071_v5  ;;  %v1354_v53 = vpop.f32.mrb[37].mxu0 }
 0x371   : > { %v3274_v54 = vpop.eup %3273  ;;  %v4111_v55 = vadd.f32 %v4071_v5, %v1354_v53  ;;  %1485 = vrot.lane.b32.xlu1 %v3272_v51, %s3625_s13  ;;  %v2979_v56 = vpop.f32.mrb[38].mxu0 }
 0x372   : > { %2378 = vst.msk [vmem:[%s4077_s6 + $0x30] sm:$0xff] %vm1608_vm0, %v4108_v52  ;;  %v4118_v57 = vadd.f32 %v2979_v56, %v4071_v5  ;;  %v1357_v58 = vpop.f32.mrb[39].mxu0  ;;  %1481 = vrot.lane.b32.xlu0 %v3274_v54, %s3625_s13  ;;  %v1423_v59 = vmul.f32 0.5, %v4108_v52  ;;  %v3276_v62 = vpop.eup %3275 }
 0x373   : > { %v1421_v60 = vmul.f32 0.5, %v4111_v55  ;;  %2376 = vst.msk [vmem:[%s4077_s6 + $0x20] sm:$0xff] %vm1608_vm0, %v4111_v55  ;;  %v4127_v61 = vadd.f32 %v4071_v5, %v1357_v58  ;;  %v3278_v6 = vpop.eup %3277 }
 0x374   : > { %2379 = vst.msk [vmem:[%s4077_s6 + $0x38] sm:$0xff] %vm1608_vm0, %v4118_v57  ;;  %v1424_v1 = vmul.f32 0.5, %v4118_v57  ;;  %v1445_v7 = vmul.f32 1.442695, %v1423_v59 }
 0x375   : > { %v1441_v63 = vmul.f32 1.442695, %v1421_v60  ;;  %v1422_v3 = vmul.f32 0.5, %v4127_v61  ;;  %2377 = vst.msk [vmem:[%s4077_s6 + $0x28] sm:$0xff] %vm1608_vm0, %v4127_v61  ;;  %1487 = vrot.lane.b32.xlu1 %v3276_v62, %s3625_s13  ;;  %v3199_v60 = vld [vmem:[#allocation8] ss:$8 sps:$4 sm:$0xff]  }
 0x376   : > { %1483 = vrot.lane.b32.xlu0 %v3278_v6, %s3625_s13  ;;  %v1447_v9 = vmul.f32 1.442695, %v1424_v1  ;;  %v3201_v62 = vld [vmem:[#allocation8 + $0x4] ss:$8 sps:$4 sm:$0xff]   ;;  %v3204_v6 = vld [vmem:[#allocation8 + $0x14] ss:$8 sps:$4 sm:$0xff]  }
 0x377   : > { %3279 = vpow2.f32 %v1441_v63  ;;  %v1443_v8 = vmul.f32 1.442695, %v1422_v3  ;;  %1862 = vmatprep.subr.bf16.mxu0 %v3201_v62  ;;  %v3202_v63 = vld [vmem:[#allocation8 + $0x10] ss:$8 sps:$4 sm:$0xff]   ;;  %v3207_v1 = vld [vmem:[#allocation8 + $0x24] ss:$8 sps:$4 sm:$0xff]  }
 0x378   : > { %1863 = vmatpush1.bf16.msra.mxu0 %v3199_v60  ;;  %v3205_v3 = vld [vmem:[#allocation8 + $0x20] ss:$8 sps:$4 sm:$0xff]  }
 0x379   : > { %3281 = vpow2.f32 %v1443_v8  ;;  %1864 = vmatprep.subr.bf16.mxu0 %v3204_v6  ;;  %v3208_v8 = vld [vmem:[#allocation8 + $0x30] ss:$8 sps:$4 sm:$0xff]  }
 0x37a   : > { %3283 = vpow2.f32 %v1445_v7  ;;  %v3210_v7 = vld [vmem:[#allocation8 + $0x34] ss:$8 sps:$4 sm:$0xff]  }
 0x37b   : > { %3285 = vpow2.f32 %v1447_v9  ;;  %v3213_v9 = vld [vmem:[#allocation8 + $0x44] ss:$8 sps:$4 sm:$0xff]  }
 0x37c   : > { %1865 = vmatpush1.bf16.msra.mxu0 %v3202_v63 }
 0x37d   : > { %1866 = vmatprep.subr.bf16.mxu0 %v3207_v1 }
 0x37f   : > { %v2982_v10 = vpop.f32.mrb[40].mxu0 }
 0x380   : > { %v4140_v11 = vadd.f32 %v2982_v10, %v4071_v5  ;;  %v1370_v12 = vpop.f32.mrb[41].mxu0  ;;  %1867 = vmatpush1.bf16.msra.mxu0 %v3205_v3  ;;  %v3211_v10 = vld [vmem:[#allocation8 + $0x40] ss:$8 sps:$4 sm:$0xff]   ;;  %v1412_v3 = vld [vmem:[%s4243_s22 + $0x58] sm:$0xff] }
 0x381   : > { %v3280_v13 = vpop.eup %3279  ;;  %v4143_v14 = vadd.f32 %v4071_v5, %v1370_v12  ;;  %v2983_v15 = vpop.f32.mrb[42].mxu0  ;;  %1868 = vmatprep.subr.bf16.mxu0 %v3210_v7  ;;  %v3216_v12 = vld [vmem:[#allocation8 + $0x54] ss:$8 sps:$4 sm:$0xff]  }
 0x382   : > { %2382 = vst.msk [vmem:[%s4077_s6 + $0x50] sm:$0xff] %vm1608_vm0, %v4140_v11  ;;  %v4149_v16 = vadd.f32 %v2983_v15, %v4071_v5  ;;  %v1373_v17 = vpop.f32.mrb[43].mxu0  ;;  %1489 = vrot.lane.b32.xlu0 %v3280_v13, %s3625_s13  ;;  %v1427_v19 = vmul.f32 0.5, %v4140_v11  ;;  %v3214_v13 = vld [vmem:[#allocation8 + $0x50] ss:$8 sps:$4 sm:$0xff]  }
 0x383   : > { %v3282_v18 = vpop.eup %3281  ;;  %v1425_v20 = vmul.f32 0.5, %v4143_v14  ;;  %2380 = vst.msk [vmem:[%s4077_s6 + $0x40] sm:$0xff] %vm1608_vm0, %v4143_v14  ;;  %v4158_v21 = vadd.f32 %v4071_v5, %v1373_v17  ;;  %v1401_v17 = vld [vmem:[%s4243_s22] sm:$0xff] }
 0x384   : > { %2383 = vst.msk [vmem:[%s4077_s6 + $0x58] sm:$0xff] %vm1608_vm0, %v4149_v16  ;;  %1491 = vrot.lane.b32.xlu1 %v3282_v18, %s3625_s13  ;;  %v3284_v22 = vpop.eup %3283  ;;  %v1428_v24 = vmul.f32 0.5, %v4149_v16  ;;  %v1453_v27 = vmul.f32 1.442695, %v1427_v19  ;;  %1869 = vmatpush1.bf16.msra.mxu0 %v3208_v8  ;;  %v1403_v19 = vld [vmem:[%s4243_s22 + $0x10] sm:$0xff] }
 0x385   : > { %v1449_v23 = vmul.f32 1.442695, %v1425_v20  ;;  %v1426_v25 = vmul.f32 0.5, %v4158_v21  ;;  %2381 = vst.msk [vmem:[%s4077_s6 + $0x48] sm:$0xff] %vm1608_vm0, %v4158_v21  ;;  %v3286_v26 = vpop.eup %3285  ;;  %1870 = vmatprep.subr.bf16.mxu0 %v3213_v9  ;;  %v1404_v20 = vld [vmem:[%s4243_s22 + $0x18] sm:$0xff] }
 0x386   : > { %1493 = vrot.lane.b32.xlu0 %v3284_v22, %s3625_s13  ;;  %v1455_v29 = vmul.f32 1.442695, %v1428_v24  ;;  %v1402_v22 = vld [vmem:[%s4243_s22 + $0x8] sm:$0xff] }
 0x387   : > { %3287 = vpow2.f32 %v1449_v23  ;;  %v1451_v28 = vmul.f32 1.442695, %v1426_v25 }
 0x388   : > { %1495 = vrot.lane.b32.xlu1 %v3286_v26, %s3625_s13  ;;  %1871 = vmatpush1.bf16.msra.mxu0 %v3211_v10 }
 0x389   : > { %3289 = vpow2.f32 %v1451_v28  ;;  %1872 = vmatprep.subr.bf16.mxu0 %v3216_v12 }
 0x38a   : > { %3291 = vpow2.f32 %v1453_v27 }
 0x38b   : > { %3293 = vpow2.f32 %v1455_v29 }
 0x38c   : > { %1873 = vmatpush1.bf16.msra.mxu0 %v3214_v13 }
 0x38f   : > { %v2986_v30 = vpop.f32.mrb[44].mxu0 }
 0x390   : > { %v4172_v31 = vadd.f32 %v2986_v30, %v4071_v5  ;;  %v1386_v32 = vpop.f32.mrb[45].mxu0 }
 0x391   : > { %v3288_v33 = vpop.eup %3287  ;;  %v4175_v34 = vadd.f32 %v4071_v5, %v1386_v32  ;;  %v2987_v36 = vpop.f32.mrb[46].mxu0 }
 0x392   : > { %2386 = vst.msk [vmem:[%s4077_s6 + $0x70] sm:$0xff] %vm1608_vm0, %v4172_v31  ;;  %v4181_v38 = vadd.f32 %v2987_v36, %v4071_v5  ;;  %v1389_v39 = vpop.f32.mrb[47].mxu0  ;;  %1497 = vrot.lane.b32.xlu0 %v3288_v33, %s3625_s13  ;;  %v1431_v42 = vmul.f32 0.5, %v4172_v31 }
 0x393   : > { %v3290_v41 = vpop.eup %3289  ;;  %v1429_v44 = vmul.f32 0.5, %v4175_v34  ;;  %2384 = vst.msk [vmem:[%s4077_s6 + $0x60] sm:$0xff] %vm1608_vm0, %v4175_v34  ;;  %v4190_v45 = vadd.f32 %v4071_v5, %v1389_v39 }
 0x394   : > { %2387 = vst.msk [vmem:[%s4077_s6 + $0x78] sm:$0xff] %vm1608_vm0, %v4181_v38  ;;  %1499 = vrot.lane.b32.xlu1 %v3290_v41, %s3625_s13  ;;  %v3292_v46 = vpop.eup %3291  ;;  %v1432_v48 = vmul.f32 0.5, %v4181_v38  ;;  %v1461_v51 = vmul.f32 1.442695, %v1431_v42  ;;  %v1405_v41 = vld [vmem:[%s4243_s22 + $0x20] sm:$0xff] }
 0x395   : > { %v1457_v47 = vmul.f32 1.442695, %v1429_v44  ;;  %v1430_v49 = vmul.f32 0.5, %v4190_v45  ;;  %2385 = vst.msk [vmem:[%s4077_s6 + $0x68] sm:$0xff] %vm1608_vm0, %v4190_v45  ;;  %v3294_v50 = vpop.eup %3293  ;;  %v1406_v44 = vld [vmem:[%s4243_s22 + $0x28] sm:$0xff]  ;;  %s2741_s6 = sshll.u32 %s4457_s15, 7 }
 0x396   : > { %1501 = vrot.lane.b32.xlu0 %v3292_v46, %s3625_s13  ;;  %v1463_v53 = vmul.f32 1.442695, %v1432_v48  ;;  %s4475_s14 = scalar_lea.vmem [#allocation12], %s2741_s6 }
 0x397   : > { %3295 = vpow2.f32 %v1457_v47  ;;  %v1459_v5 = vmul.f32 1.442695, %v1430_v49  ;;  %v1408_v49 = vld [vmem:[%s4243_s22 + $0x38] sm:$0xff] }
 0x398   : > { %1503 = vrot.lane.b32.xlu1 %v3294_v50, %s3625_s13 }
 0x399   : > { %3297 = vpow2.f32 %v1459_v5 }
 0x39a   : > { %3299 = vpow2.f32 %v1461_v51 }
 0x39b   : > { %3301 = vpow2.f32 %v1463_v53 }
 0x3a1   : > { %v3296_v54 = vpop.eup %3295 }
 0x3a2   : > { %1505 = vrot.lane.b32.xlu0 %v3296_v54, %s3625_s13 }
 0x3a3   : > { %v3298_v56 = vpop.eup %3297 }
 0x3a4   : > { %1507 = vrot.lane.b32.xlu1 %v3298_v56, %s3625_s13  ;;  %v3300_v58 = vpop.eup %3299 }
 0x3a5   : > { %v3302_v59 = vpop.eup %3301 }
 0x3a6   : > { %1509 = vrot.lane.b32.xlu0 %v3300_v58, %s3625_s13 }
 0x3a8   : > { %1511 = vrot.lane.b32.xlu1 %v3302_v59, %s3625_s13  ;;  %v1409_v59 = vld [vmem:[%s4243_s22 + $0x40] sm:$0xff] }
 0x3aa   : > { %2404 = vrot.lane.b32.xlu0 %v4083_v37, %s3625_s13 }
 0x3ac   : > { %2406 = vrot.lane.b32.xlu1 %v4097_v43, %s3625_s13 }
 0x3ae   : > { %2408 = vrot.lane.b32.xlu0 %v4080_v35, %s3625_s13 }
 0x3b0   : > { %2410 = vrot.lane.b32.xlu1 %v4090_v40, %s3625_s13 }
 0x3b2   : > { %2412 = vrot.lane.b32.xlu0 %v4111_v55, %s3625_s13 }
 0x3b4   : > { %2414 = vrot.lane.b32.xlu1 %v4127_v61, %s3625_s13 }
 0x3b6   : > { %2416 = vrot.lane.b32.xlu0 %v4108_v52, %s3625_s13 }
 0x3b8   : > { %2418 = vrot.lane.b32.xlu1 %v4118_v57, %s3625_s13 }
 0x3ba   : > { %2420 = vrot.lane.b32.xlu0 %v4143_v14, %s3625_s13 }
 0x3bc   : > { %2422 = vrot.lane.b32.xlu1 %v4158_v21, %s3625_s13 }
 0x3be   : > { %2424 = vrot.lane.b32.xlu0 %v4140_v11, %s3625_s13 }
 0x3c0   : > { %2426 = vrot.lane.b32.xlu1 %v4149_v16, %s3625_s13 }
 0x3c2   : > { %2428 = vrot.lane.b32.xlu0 %v4175_v34, %s3625_s13 }
 0x3c4   : > { %2430 = vrot.lane.b32.xlu1 %v4190_v45, %s3625_s13 }
 0x3c6   : > { %2432 = vrot.lane.b32.xlu0 %v4172_v31, %s3625_s13 }
 0x3c8   : > { %2434 = vrot.lane.b32.xlu1 %v4181_v38, %s3625_s13  ;;  %s4471_s13 = scalar_lea.vmem [#allocation11], %s2741_s6  ;;  %s3626_s6 = smov [#allocation11]  }
 0x3c9   : > { %s2497_s29 = sshll.u32 %s4471_s13, 4  ;;  %s3511_s27 = sshll.u32 %s3626_s6, 4  ;;  %s4539_s29 = int_to_ptr.vmem [resolvable:$true] %s2497_s29  ;;  %s3512_s27 = int_to_ptr.vmem [resolvable:$false] %s3511_s27 }
 0x3ca   : > { %p3514_p8 = scmp.lt.s32.totalorder %s4539_s29, %s3512_s27 }
 0x3e3   : > { %v1486_v15 = vpop.permute.xlu1 %1485 }
 0x3e4   : > { %v1482_v18 = vpop.permute.xlu0 %1481  ;;  %v1531_v25 = vmul.f32 %v1486_v15, %v1403_v19 }
 0x3e5   : > { %v1529_v23 = vmul.f32 %v1482_v18, %v1401_v17  ;;  %v1413_v17 = vld [vmem:[%s4243_s22 + $0x60] sm:$0xff]  ;;  %v1414_v18 = vld [vmem:[%s4243_s22 + $0x68] sm:$0xff] }
 0x3e6   : > { %v1547_v33 = vadd.f32 %v1531_v25, %v4080_v35 }
 0x3e7   : > { %v1488_v24 = vpop.permute.xlu1 %1487  ;;  %v1545_v30 = vadd.f32 %v1529_v23, %v4083_v37 }
 0x3e8   : > { %v1532_v26 = vmul.f32 %v1488_v24, %v1404_v20  ;;  %v1484_v27 = vpop.permute.xlu0 %1483  ;;  %v1415_v20 = vld [vmem:[%s4243_s22 + $0x70] sm:$0xff]  ;;  %v1416_v24 = vld [vmem:[%s4243_s22 + $0x78] sm:$0xff] }
 0x3e9   : > { %v1530_v28 = vmul.f32 %v1484_v27, %v1402_v22 }
 0x3ea   : > { %v1548_v29 = vadd.f32 %v1532_v26, %v4090_v40  ;;  %v1407_v40 = vld [vmem:[%s4243_s22 + $0x30] sm:$0xff] }
 0x3eb   : > { %v1546_v32 = vadd.f32 %v1530_v28, %v4097_v43 }
 0x3ec   : > { %v1562_v39 = vpack.c.bf16 %v1548_v29, %v1547_v33 }
 0x3ed   : > { %v1561_v36 = vpack.c.bf16 %v1546_v32, %v1545_v30 }
 0x3ef   : > { %2996 = vmatprep.mubr.msk.bf16.mxu1 %vm1608_vm0, %v1561_v36 }
 0x3f0   : > { %2997 = vmatmul.mubr.msk.bf16.vlgmr.msra.gmra.mrb[32].mxu1 %vm1608_vm0, %v1562_v39 }
 0x3f4   : > { %v1490_v42 = vpop.permute.xlu0 %1489 }
 0x3f5   : > { %v1533_v46 = vmul.f32 %v1490_v42, %v1405_v41 }
 0x3f6   : > { %v1492_v47 = vpop.permute.xlu1 %1491 }
 0x3f7   : > { %v1534_v48 = vmul.f32 %v1492_v47, %v1406_v44  ;;  %v1549_v43 = vadd.f32 %v1533_v46, %v4111_v55  ;;  %v1410_v55 = vld [vmem:[%s4243_s22 + $0x48] sm:$0xff] }
 0x3f8   : > { %v1494_v37 = vpop.permute.xlu0 %1493 }
 0x3f9   : > { %v1550_v35 = vadd.f32 %v1534_v48, %v4127_v61  ;;  %v1535_v50 = vmul.f32 %v1494_v37, %v1407_v40  ;;  %v1411_v61 = vld [vmem:[%s4243_s22 + $0x50] sm:$0xff]  ;;  %s2513_s22 = sshll.u32 %s4475_s14, 4  ;;  %s4550_s22 = int_to_ptr.vmem [resolvable:$true] %s2513_s22 }
 0x3fa   : > { %v1496_v51 = vpop.permute.xlu1 %1495 }
 0x3fb   : > { %v1563_v5 = vpack.c.bf16 %v1550_v35, %v1549_v43  ;;  %v1536_v53 = vmul.f32 %v1496_v51, %v1408_v49  ;;  %v1551_v54 = vadd.f32 %v1535_v50, %v4108_v52  ;;  %v3219_v43 = vld [vmem:[#allocation8 + $0x64] ss:$8 sps:$4 sm:$0xff]   ;;  %v3217_v35 = vld [vmem:[#allocation8 + $0x60] ss:$8 sps:$4 sm:$0xff]   ;;  %v3222_v50 = vld [vmem:[#allocation8 + $0x74] ss:$8 sps:$4 sm:$0xff]  }
 0x3fc   : > { %1874 = vmatprep.subr.bf16.mxu0 %v3219_v43  ;;  %v3220_v51 = vld [vmem:[#allocation8 + $0x70] ss:$8 sps:$4 sm:$0xff]  }
 0x3fd   : > { %v1552_v56 = vadd.f32 %v1536_v53, %v4118_v57  ;;  %3000 = vmatprep.mubr.msk.bf16.mxu1 %vm1608_vm0, %v1563_v5  ;;  %1875 = vmatpush1.bf16.msra.mxu0 %v3217_v35  ;;  %v3225_v5 = vld [vmem:[#allocation10 + $0x4] ss:$8 sps:$4 sm:$0xff]   ;;  %v3223_v53 = vld [vmem:[#allocation10] ss:$8 sps:$4 sm:$0xff]  }
 0x3fe   : > { %1876 = vmatprep.subr.bf16.mxu0 %v3222_v50  ;;  %3012 = vmatprep.subr.bf16.mxu1 %v3225_v5 }
 0x3ff   : > { %v1564_v58 = vpack.c.bf16 %v1552_v56, %v1551_v54  ;;  %v3228_v54 = vld [vmem:[#allocation10 + $0x14] ss:$8 sps:$4 sm:$0xff]   ;;  %3028 = vmatpush1.bf16.msra.mxu1 %v3223_v53  ;;  %v3226_v56 = vld [vmem:[#allocation10 + $0x10] ss:$8 sps:$4 sm:$0xff]  }
 0x400   : > { %3013 = vmatprep.subr.bf16.mxu1 %v3228_v54 }
 0x401   : > { %3001 = vmatmul.mubr.msk.bf16.gmra.mrb[36].mxu1 %vm1608_vm0, %v1564_v58  ;;  %1877 = vmatpush1.bf16.msra.mxu0 %v3220_v51  ;;  %v3231_v58 = vld [vmem:[#allocation10 + $0x24] ss:$8 sps:$4 sm:$0xff]  }
 0x402   : > { %2227 = vmatprep.subr.bf16.mxu0 %v3225_v5 }
 0x403   : > { %3029 = vmatpush1.bf16.msra.mxu1 %v3226_v56 }
 0x404   : > { %v1498_v60 = vpop.permute.xlu0 %1497  ;;  %3014 = vmatprep.subr.bf16.mxu1 %v3231_v58 }
 0x405   : > { %v1537_v62 = vmul.f32 %v1498_v60, %v1409_v59  ;;  %v3229_v59 = vld [vmem:[#allocation10 + $0x20] ss:$8 sps:$4 sm:$0xff]   ;;  %v4323_v60 = vld [vmem:[#allocation10 + $0x34] ss:$8 sps:$4 sm:$0xff]  }
 0x406   : > { %v1500_v6 = vpop.permute.xlu1 %1499 }
 0x407   : > { %v1538_v63 = vmul.f32 %v1500_v6, %v1410_v55  ;;  %v1553_v52 = vadd.f32 %v1537_v62, %v4143_v14  ;;  %3030 = vmatpush1.bf16.msra.mxu1 %v3229_v59  ;;  %v4326_v55 = vld [vmem:[#allocation10 + $0x30] ss:$8 sps:$4 sm:$0xff]   ;;  %v4328_v62 = vld [vmem:[#allocation10 + $0x44] ss:$8 sps:$4 sm:$0xff]   ;;  %v4332_v6 = vld [vmem:[#allocation10 + $0x40] ss:$8 sps:$4 sm:$0xff]  }
 0x408   : > { %v1502_v1 = vpop.permute.xlu0 %1501  ;;  %3015 = vmatprep.subr.bf16.mxu1 %v4323_v60 }
 0x409   : > { %v1554_v57 = vadd.f32 %v1538_v63, %v4158_v21  ;;  %v1539_v7 = vmul.f32 %v1502_v1, %v1411_v61  ;;  %v4334_v61 = vld [vmem:[#allocation10 + $0x54] ss:$8 sps:$4 sm:$0xff]   ;;  %v4338_v63 = vld [vmem:[#allocation10 + $0x50] ss:$8 sps:$4 sm:$0xff]   ;;  %v4340_v1 = vld [vmem:[#allocation10 + $0x64] ss:$8 sps:$4 sm:$0xff]  }
 0x40a   : > { %v1504_v8 = vpop.permute.xlu1 %1503 }
 0x40b   : > { %v1565_v9 = vpack.c.bf16 %v1554_v57, %v1553_v52  ;;  %v1540_v10 = vmul.f32 %v1504_v8, %v1412_v3  ;;  %v1555_v12 = vadd.f32 %v1539_v7, %v4140_v11  ;;  %3031 = vmatpush1.bf16.msra.mxu1 %v4326_v55  ;;  %v4344_v3 = vld [vmem:[#allocation10 + $0x60] ss:$8 sps:$4 sm:$0xff]   ;;  %v4346_v52 = vld [vmem:[#allocation10 + $0x74] ss:$8 sps:$4 sm:$0xff]   ;;  %v4350_v57 = vld [vmem:[#allocation10 + $0x70] ss:$8 sps:$4 sm:$0xff]  }
 0x40c   : > { %3016 = vmatprep.subr.bf16.mxu1 %v4328_v62  ;;  %v4352_v7 = vld [vmem:[#allocation10 + $0x84] ss:$8 sps:$4 sm:$0xff]   ;;  %v4356_v8 = vld [vmem:[#allocation10 + $0x80] ss:$8 sps:$4 sm:$0xff]  }
 0x40d   : > { %v1556_v13 = vadd.f32 %v1540_v10, %v4149_v16  ;;  %3004 = vmatprep.mubr.msk.bf16.mxu1 %vm1608_vm0, %v1565_v9  ;;  %v4358_v9 = vld [vmem:[#allocation10 + $0x94] ss:$8 sps:$4 sm:$0xff]   ;;  %v4362_v10 = vld [vmem:[#allocation10 + $0x90] ss:$8 sps:$4 sm:$0xff]  }
 0x40f   : > { %v1566_v15 = vpack.c.bf16 %v1556_v13, %v1555_v12  ;;  %3032 = vmatpush1.bf16.msra.mxu1 %v4332_v6  ;;  %v4364_v12 = vld [vmem:[#allocation10 + $0xa4] ss:$8 sps:$4 sm:$0xff]   ;;  %v4368_v13 = vld [vmem:[#allocation10 + $0xa0] ss:$8 sps:$4 sm:$0xff]  }
 0x410   : > { %3017 = vmatprep.subr.bf16.mxu1 %v4334_v61 }
 0x411   : > { %3005 = vmatmul.mubr.msk.bf16.gmra.mrb[40].mxu1 %vm1608_vm0, %v1566_v15  ;;  %v4374_v15 = vld [vmem:[%s4634_s9] ss:$0 sm:$0xff] }
 0x413   : > { %3033 = vmatpush1.bf16.msra.mxu1 %v4338_v63 }
 0x414   : > { %v1506_v14 = vpop.permute.xlu0 %1505  ;;  %3018 = vmatprep.subr.bf16.mxu1 %v4340_v1 }
 0x415   : > { %v1541_v19 = vmul.f32 %v1506_v14, %v1413_v17 }
 0x416   : > { %v1508_v21 = vpop.permute.xlu1 %1507 }
 0x417   : > { %v1542_v22 = vmul.f32 %v1508_v21, %v1414_v18  ;;  %v1557_v25 = vadd.f32 %v1541_v19, %v4175_v34  ;;  %3034 = vmatpush1.bf16.msra.mxu1 %v4344_v3 }
 0x418   : > { %v1510_v23 = vpop.permute.xlu0 %1509  ;;  %3019 = vmatprep.subr.bf16.mxu1 %v4346_v52 }
 0x419   : > { %v1558_v11 = vadd.f32 %v1542_v22, %v4190_v45  ;;  %v1543_v16 = vmul.f32 %v1510_v23, %v1415_v20 }
 0x41a   : > { %v1512_v26 = vpop.permute.xlu1 %1511 }
 0x41b   : > { %v1567_v27 = vpack.c.bf16 %v1558_v11, %v1557_v25  ;;  %v1544_v28 = vmul.f32 %v1512_v26, %v1416_v24  ;;  %v1559_v34 = vadd.f32 %v1543_v16, %v4172_v31  ;;  %3035 = vmatpush1.bf16.msra.mxu1 %v4350_v57 }
 0x41c   : > { %v2405_v29 = vpop.permute.xlu0 %2404  ;;  %3020 = vmatprep.subr.bf16.mxu1 %v4352_v7 }
 0x41d   : > { %v1560_v45 = vadd.f32 %v1544_v28, %v4181_v38  ;;  %2452 = vst.msk [vmem:[%s4285_s24] sm:$0xff] %vm1608_vm0, %v2405_v29  ;;  %3008 = vmatprep.mubr.msk.bf16.mxu1 %vm1608_vm0, %v1567_v27 }
 0x41e   : > { %v2407_v30 = vpop.permute.xlu1 %2406 }
 0x41f   : > { %v1568_v32 = vpack.c.bf16 %v1560_v45, %v1559_v34  ;;  %2453 = vst.msk [vmem:[%s4285_s24 + $0x8] sm:$0xff] %vm1608_vm0, %v2407_v30  ;;  %3036 = vmatpush1.bf16.msra.mxu1 %v4356_v8 }
 0x420   : > { %v2409_v33 = vpop.permute.xlu0 %2408  ;;  %3021 = vmatprep.subr.bf16.mxu1 %v4358_v9 }
 0x421   : > { %2454 = vst.msk [vmem:[%s4285_s24 + $0x10] sm:$0xff] %vm1608_vm0, %v2409_v33  ;;  %3009 = vmatmul.mubr.msk.bf16.gmra.mrb[44].mxu1 %vm1608_vm0, %v1568_v32 }
 0x422   : > { %v2411_v31 = vpop.permute.xlu1 %2410 }
 0x423   : > { %2455 = vst.msk [vmem:[%s4285_s24 + $0x18] sm:$0xff] %vm1608_vm0, %v2411_v31  ;;  %3037 = vmatpush1.bf16.msra.mxu1 %v4362_v10 }
 0x424   : > { %v2413_v38 = vpop.permute.xlu0 %2412  ;;  %3022 = vmatprep.subr.bf16.mxu1 %v4364_v12 }
 0x425   : > { %2456 = vst.msk [vmem:[%s4285_s24 + $0x20] sm:$0xff] %vm1608_vm0, %v2413_v38 }
 0x426   : > { %v2415_v36 = vpop.permute.xlu1 %2414 }
 0x427   : > { %2457 = vst.msk [vmem:[%s4285_s24 + $0x28] sm:$0xff] %vm1608_vm0, %v2415_v36  ;;  %3038 = vmatpush1.bf16.msra.mxu1 %v4368_v13 }
 0x428   : > { %v2417_v39 = vpop.permute.xlu0 %2416 }
 0x429   : > { %2458 = vst.msk [vmem:[%s4285_s24 + $0x30] sm:$0xff] %vm1608_vm0, %v2417_v39 }
 0x42a   : > { %v2419_v41 = vpop.permute.xlu1 %2418 }
 0x42b   : > { %2459 = vst.msk [vmem:[%s4285_s24 + $0x38] sm:$0xff] %vm1608_vm0, %v2419_v41 }
 0x42c   : > { %v2421_v42 = vpop.permute.xlu0 %2420 }
 0x42d   : > { %2460 = vst.msk [vmem:[%s4285_s24 + $0x40] sm:$0xff] %vm1608_vm0, %v2421_v42 }
 0x42e   : > { %v2423_v44 = vpop.permute.xlu1 %2422 }
 0x42f   : > { %2461 = vst.msk [vmem:[%s4285_s24 + $0x48] sm:$0xff] %vm1608_vm0, %v2423_v44 }
 0x430   : > { %v2425_v46 = vpop.permute.xlu0 %2424 }
 0x431   : > { %2462 = vst.msk [vmem:[%s4285_s24 + $0x50] sm:$0xff] %vm1608_vm0, %v2425_v46 }
 0x432   : > { %v2427_v47 = vpop.permute.xlu1 %2426 }
 0x433   : > { %2463 = vst.msk [vmem:[%s4285_s24 + $0x58] sm:$0xff] %vm1608_vm0, %v2427_v47 }
 0x434   : > { %v2429_v40 = vpop.permute.xlu0 %2428 }
 0x435   : > { %2464 = vst.msk [vmem:[%s4285_s24 + $0x60] sm:$0xff] %vm1608_vm0, %v2429_v40 }
 0x436   : > { %v2431_v48 = vpop.permute.xlu1 %2430 }
 0x437   : > { %2465 = vst.msk [vmem:[%s4285_s24 + $0x68] sm:$0xff] %vm1608_vm0, %v2431_v48 }
 0x438   : > { %v2433_v37 = vpop.permute.xlu0 %2432 }
 0x439   : > { %2466 = vst.msk [vmem:[%s4285_s24 + $0x70] sm:$0xff] %vm1608_vm0, %v2433_v37 }
 0x43a   : > { %v2435_v49 = vpop.permute.xlu1 %2434 }
 0x43b   : > { %2467 = vst.msk [vmem:[%s4285_s24 + $0x78] sm:$0xff] %vm1608_vm0, %v2435_v49  ;;  %s3513_s24 = scalar_lea.vmem %s3512_s27, 4096 }
 0x4c3   : > { %v2998_v17 = vpop.f32.mrb[32].mxu1 }
 0x4c4   : > { %v1676_v14 = vadd.f32 %v2998_v17, %v4374_v15  ;;  %v1667_v18 = vpop.f32.mrb[33].mxu1  ;;  %v3262_v17 = vld [vmem:[#allocation10 + $0xd0] ss:$8 sps:$4 sm:$0xff]  }
 0x4c5   : > { %v1668_v19 = vadd.f32 %v4374_v15, %v1667_v18  ;;  %v2999_v21 = vpop.f32.mrb[34].mxu1  ;;  %v3268_v18 = vld [vmem:[#allocation10 + $0xf0] ss:$8 sps:$4 sm:$0xff]  }
 0x4c6   : > { %v1679_v20 = vadd.f32 %v2999_v21, %v4374_v15  ;;  %v1670_v22 = vpop.f32.mrb[35].mxu1  ;;  %v1732_v24 = vmax.f32 %v1676_v14, 0.0  ;;  %v3265_v14 = vld [vmem:[#allocation10 + $0xe0] ss:$8 sps:$4 sm:$0xff]  }
 0x4c7   : > { %v1671_v23 = vadd.f32 %v4374_v15, %v1670_v22  ;;  %v1730_v11 = vmax.f32 %v1668_v19, 0.0  ;;  %v3270_v19 = vld [vmem:[#allocation10 + $0xf4] ss:$8 sps:$4 sm:$0xff]   ;;  %v1770_v21 = vld [vmem:[%s4636_s11] sm:$0x3] }
 0x4c8   : > { %v1733_v25 = vmax.f32 %v1679_v20, 0.0  ;;  %v4419_v20 = vrot.slane %v1770_v21, %v4001_v2  ;;  %v4422_v22 = vrot.slane %v1770_v21, %v4006_v4 }
 0x4c9   : > { %v1731_v16 = vmax.f32 %v1671_v23, 0.0 }
 0x4ca   : > { %v1747_v26 = vpack.c.bf16 %v1733_v25, %v1732_v24 }
 0x4cb   : > { %v1746_v27 = vpack.c.bf16 %v1731_v16, %v1730_v11 }
 0x4cd   : > { %1895 = vmatmul.mubr.bf16.vlgmr.msra.gmra.mrb[48].mxu0 %v1746_v27 }
 0x4ce   : > { %1904 = vmatprep.mubr.bf16.mxu0 %v3624_v0  ;;  %2228 = vmatpush1.bf16.msra.mxu0 %v3223_v53 }
 0x4cf   : > { %2229 = vmatprep.subr.bf16.mxu0 %v3228_v54 }
 0x4d2   : > { %2230 = vmatpush1.bf16.msra.mxu0 %v3226_v56 }
 0x4d3   : > { %2231 = vmatprep.subr.bf16.mxu0 %v3231_v58 }
 0x4d4   : > { %v3002_v28 = vpop.f32.mrb[36].mxu1 }
 0x4d5   : > { %v1692_v29 = vadd.f32 %v3002_v28, %v4374_v15  ;;  %v1683_v34 = vpop.f32.mrb[37].mxu1  ;;  %1905 = vmatmul.mubr.bf16.gmra.mrb[52].mxu0 %v1747_v26 }
 0x4d6   : > { %v1684_v45 = vadd.f32 %v4374_v15, %v1683_v34  ;;  %v3003_v30 = vpop.f32.mrb[38].mxu1  ;;  %1914 = vmatprep.mubr.bf16.mxu0 %v3624_v0  ;;  %2232 = vmatpush1.bf16.msra.mxu0 %v3229_v59 }
 0x4d7   : > { %v1695_v32 = vadd.f32 %v3003_v30, %v4374_v15  ;;  %v1686_v33 = vpop.f32.mrb[39].mxu1  ;;  %2233 = vmatprep.subr.bf16.mxu0 %v4323_v60  ;;  %v1736_v38 = vmax.f32 %v1692_v29, 0.0 }
 0x4d8   : > { %v1687_v31 = vadd.f32 %v4374_v15, %v1686_v33  ;;  %v1734_v39 = vmax.f32 %v1684_v45, 0.0 }
 0x4d9   : > { %v1737_v36 = vmax.f32 %v1695_v32, 0.0 }
 0x4da   : > { %v1735_v41 = vmax.f32 %v1687_v31, 0.0  ;;  %2234 = vmatpush1.bf16.msra.mxu0 %v4326_v55 }
 0x4db   : > { %v1749_v42 = vpack.c.bf16 %v1737_v36, %v1736_v38  ;;  %2235 = vmatprep.subr.bf16.mxu0 %v4328_v62 }
 0x4dc   : > { %v1748_v44 = vpack.c.bf16 %v1735_v41, %v1734_v39 }
 0x4de   : > { %1915 = vmatmul.mubr.bf16.gmra.mrb[56].mxu0 %v1748_v44 }
 0x4df   : > { %1924 = vmatprep.mubr.bf16.mxu0 %v3624_v0  ;;  %2236 = vmatpush1.bf16.msra.mxu0 %v4332_v6 }
 0x4e0   : > { %2237 = vmatprep.subr.bf16.mxu0 %v4334_v61 }
 0x4e3   : > { %2238 = vmatpush1.bf16.msra.mxu0 %v4338_v63 }
 0x4e4   : > { %v3006_v46 = vpop.f32.mrb[40].mxu1  ;;  %2239 = vmatprep.subr.bf16.mxu0 %v4340_v1 }
 0x4e5   : > { %v1708_v47 = vadd.f32 %v3006_v46, %v4374_v15  ;;  %v1699_v40 = vpop.f32.mrb[41].mxu1 }
 0x4e6   : > { %v1700_v48 = vadd.f32 %v4374_v15, %v1699_v40  ;;  %v3007_v37 = vpop.f32.mrb[42].mxu1  ;;  %1925 = vmatmul.mubr.bf16.gmra.mrb[60].mxu0 %v1749_v42 }
 0x4e7   : > { %v1711_v49 = vadd.f32 %v3007_v37, %v4374_v15  ;;  %v1702_v43 = vpop.f32.mrb[43].mxu1  ;;  %1934 = vmatprep.mubr.bf16.mxu0 %v3624_v0  ;;  %2240 = vmatpush1.bf16.msra.mxu0 %v4344_v3  ;;  %v1740_v50 = vmax.f32 %v1708_v47, 0.0 }
 0x4e8   : > { %v1703_v35 = vadd.f32 %v4374_v15, %v1702_v43  ;;  %2241 = vmatprep.subr.bf16.mxu0 %v4346_v52  ;;  %v1738_v5 = vmax.f32 %v1700_v48, 0.0 }
 0x4e9   : > { %v1741_v51 = vmax.f32 %v1711_v49, 0.0 }
 0x4ea   : > { %v1739_v53 = vmax.f32 %v1703_v35, 0.0 }
 0x4eb   : > { %v1751_v54 = vpack.c.bf16 %v1741_v51, %v1740_v50  ;;  %2242 = vmatpush1.bf16.msra.mxu0 %v4350_v57 }
 0x4ec   : > { %v1750_v56 = vpack.c.bf16 %v1739_v53, %v1738_v5  ;;  %2243 = vmatprep.subr.bf16.mxu0 %v4352_v7 }
 0x4ee   : > { %1935 = vmatmul.mubr.bf16.gmra.mrb[64].mxu0 %v1750_v56 }
 0x4ef   : > { %1944 = vmatprep.mubr.bf16.mxu0 %v3624_v0  ;;  %2244 = vmatpush1.bf16.msra.mxu0 %v4356_v8 }
 0x4f0   : > { %2245 = vmatprep.subr.bf16.mxu0 %v4358_v9  ;;  %v3258_v9 = vld [vmem:[#allocation10 + $0xb4] ss:$8 sps:$4 sm:$0xff]  }
 0x4f1   : > { %3023 = vmatprep.subr.bf16.mxu1 %v3258_v9 }
 0x4f3   : > { %2246 = vmatpush1.bf16.msra.mxu0 %v4362_v10  ;;  %v3256_v10 = vld [vmem:[#allocation10 + $0xb0] ss:$8 sps:$4 sm:$0xff]  }
 0x4f4   : > { %v3010_v58 = vpop.f32.mrb[44].mxu1  ;;  %2247 = vmatprep.subr.bf16.mxu0 %v4364_v12  ;;  %3039 = vmatpush1.bf16.msra.mxu1 %v3256_v10  ;;  %v3261_v12 = vld [vmem:[#allocation10 + $0xc4] ss:$8 sps:$4 sm:$0xff]  }
 0x4f5   : > { %v1724_v59 = vadd.f32 %v3010_v58, %v4374_v15  ;;  %v1715_v60 = vpop.f32.mrb[45].mxu1  ;;  %3024 = vmatprep.subr.bf16.mxu1 %v3261_v12 }
 0x4f6   : > { %v1716_v55 = vadd.f32 %v4374_v15, %v1715_v60  ;;  %v3011_v62 = vpop.f32.mrb[46].mxu1  ;;  %1945 = vmatmul.mubr.bf16.gmra.mrb[68].mxu0 %v1751_v54 }
 0x4f7   : > { %v1727_v6 = vadd.f32 %v3011_v62, %v4374_v15  ;;  %v1718_v61 = vpop.f32.mrb[47].mxu1  ;;  %1954 = vmatprep.mubr.bf16.mxu0 %v3624_v0  ;;  %2248 = vmatpush1.bf16.msra.mxu0 %v4368_v13  ;;  %v1744_v1 = vmax.f32 %v1724_v59, 0.0  ;;  %v3259_v13 = vld [vmem:[#allocation10 + $0xc0] ss:$8 sps:$4 sm:$0xff]  }
 0x4f8   : > { %v1719_v63 = vadd.f32 %v4374_v15, %v1718_v61  ;;  %v1742_v52 = vmax.f32 %v1716_v55, 0.0  ;;  %2249 = vmatprep.subr.bf16.mxu0 %v3258_v9  ;;  %3040 = vmatpush1.bf16.msra.mxu1 %v3259_v13  ;;  %v3264_v15 = vld [vmem:[#allocation10 + $0xd4] ss:$8 sps:$4 sm:$0xff]  }
 0x4f9   : > { %v1745_v3 = vmax.f32 %v1727_v6, 0.0  ;;  %3025 = vmatprep.subr.bf16.mxu1 %v3264_v15 }
 0x4fa   : > { %v1743_v57 = vmax.f32 %v1719_v63, 0.0 }
 0x4fb   : > { %v1753_v7 = vpack.c.bf16 %v1745_v3, %v1744_v1  ;;  %2250 = vmatpush1.bf16.msra.mxu0 %v3256_v10 }
 0x4fc   : > { %v1752_v8 = vpack.c.bf16 %v1743_v57, %v1742_v52  ;;  %2251 = vmatprep.subr.bf16.mxu0 %v3261_v12  ;;  %3041 = vmatpush1.bf16.msra.mxu1 %v3262_v17 }
 0x4fe   : > { %1955 = vmatmul.mubr.bf16.gmra.mrb[72].mxu0 %v1752_v8 }
 0x4ff   : > { %1964 = vmatprep.mubr.bf16.mxu0 %v3624_v0  ;;  %2252 = vmatpush1.bf16.msra.mxu0 %v3259_v13  ;;  %v3267_v0 = vld [vmem:[#allocation10 + $0xe4] ss:$8 sps:$4 sm:$0xff]  }
 0x500   : > { %2253 = vmatprep.subr.bf16.mxu0 %v3264_v15  ;;  %3026 = vmatprep.subr.bf16.mxu1 %v3267_v0 }
 0x501   : > { %3042 = vmatpush1.bf16.msra.mxu1 %v3265_v14 }
 0x502   : > { %3027 = vmatprep.subr.bf16.mxu1 %v3270_v19 }
 0x503   : > { %2254 = vmatpush1.bf16.msra.mxu0 %v3262_v17 }
 0x504   : > { %2255 = vmatprep.subr.bf16.mxu0 %v3267_v0 }
 0x505   : > { %3043 = vmatpush1.bf16.msra.mxu1 %v3268_v18 }
 0x506   : > { %1965 = vmatmul.mubr.bf16.gmra.mrb[76].mxu0 %v1753_v7 }
 0x507   : > { %2256 = vmatpush1.bf16.msra.mxu0 %v3265_v14 }
 0x508   : > { %2257 = vmatprep.subr.bf16.mxu0 %v3270_v19 }
 0x50b   : > { %2258 = vmatpush1.bf16.msra.mxu0 %v3268_v18 }
 0x5a0   : > { %v1896_v23 = vpop.f32.mrb[48].mxu0 }
 0x5a1   : > { %v1897_v24 = vadd.f32 %v1896_v23, %v4419_v20  ;;  %v1898_v25 = vpop.f32.mrb[49].mxu0 }
 0x5a2   : > { %v1899_v11 = vadd.f32 %v1898_v25, %v4422_v22  ;;  %v1900_v16 = vpop.f32.mrb[50].mxu0 }
 0x5a3   : > { %3303 = vtanh.f32 %v1897_v24  ;;  %v1901_v26 = vadd.f32 %v1900_v16, %v4419_v20  ;;  %v1902_v27 = vpop.f32.mrb[51].mxu0 }
 0x5a4   : > { %3305 = vtanh.f32 %v1899_v11  ;;  %v1903_v28 = vadd.f32 %v1902_v27, %v4422_v22 }
 0x5a5   : > { %3307 = vtanh.f32 %v1901_v26 }
 0x5a6   : > { %3309 = vtanh.f32 %v1903_v28 }
 0x5a8   : > { %v1906_v29 = vpop.f32.mrb[52].mxu0 }
 0x5a9   : > { %v1907_v34 = vadd.f32 %v1906_v29, %v4419_v20  ;;  %v1908_v45 = vpop.f32.mrb[53].mxu0 }
 0x5aa   : > { %v1909_v30 = vadd.f32 %v1908_v45, %v4422_v22  ;;  %v1910_v32 = vpop.f32.mrb[54].mxu0 }
 0x5ab   : > { %3311 = vtanh.f32 %v1907_v34  ;;  %v1911_v33 = vadd.f32 %v1910_v32, %v4419_v20  ;;  %v1912_v31 = vpop.f32.mrb[55].mxu0 }
 0x5ac   : > { %3313 = vtanh.f32 %v1909_v30  ;;  %v1913_v38 = vadd.f32 %v1912_v31, %v4422_v22 }
 0x5ad   : > { %v3304_v36 = vpop.eup %3303  ;;  %3315 = vtanh.f32 %v1911_v33 }
 0x5ae   : > { %v3306_v39 = vpop.eup %3305  ;;  %3317 = vtanh.f32 %v1913_v38 }
 0x5af   : > { %v3308_v41 = vpop.eup %3307 }
 0x5b0   : > { %v3310_v42 = vpop.eup %3309  ;;  %v2007_v44 = vpack.c.bf16 %v3308_v41, %v3304_v36 }
 0x5b1   : > { %v1916_v46 = vpop.f32.mrb[56].mxu0  ;;  %v2008_v47 = vpack.c.bf16 %v3310_v42, %v3306_v39 }
 0x5b2   : > { %v1917_v40 = vadd.f32 %v1916_v46, %v4419_v20  ;;  %v1918_v48 = vpop.f32.mrb[57].mxu0 }
 0x5b3   : > { %v1919_v37 = vadd.f32 %v1918_v48, %v4422_v22  ;;  %v1920_v49 = vpop.f32.mrb[58].mxu0  ;;  %2259 = vmatprep.mubr.bf16.mxu0 %v2008_v47 }
 0x5b4   : > { %3319 = vtanh.f32 %v1917_v40  ;;  %v1921_v43 = vadd.f32 %v1920_v49, %v4419_v20  ;;  %v1922_v35 = vpop.f32.mrb[59].mxu0  ;;  %2260 = vmatmul.mubr.bf16.vlgmr.msra.gmra.mrb[80].mxu0 %v2007_v44 }
 0x5b5   : > { %v3312_v50 = vpop.eup %3311  ;;  %3321 = vtanh.f32 %v1919_v37  ;;  %v1923_v51 = vadd.f32 %v1922_v35, %v4422_v22 }
 0x5b6   : > { %v3314_v5 = vpop.eup %3313  ;;  %3323 = vtanh.f32 %v1921_v43 }
 0x5b7   : > { %v3316_v53 = vpop.eup %3315  ;;  %3325 = vtanh.f32 %v1923_v51 }
 0x5b8   : > { %v3318_v54 = vpop.eup %3317  ;;  %v2009_v56 = vpack.c.bf16 %v3316_v53, %v3312_v50 }
 0x5b9   : > { %v1926_v58 = vpop.f32.mrb[60].mxu0  ;;  %v2010_v59 = vpack.c.bf16 %v3318_v54, %v3314_v5 }
 0x5ba   : > { %v1927_v60 = vadd.f32 %v1926_v58, %v4419_v20  ;;  %v1928_v55 = vpop.f32.mrb[61].mxu0 }
 0x5bb   : > { %v1929_v62 = vadd.f32 %v1928_v55, %v4422_v22  ;;  %v1930_v6 = vpop.f32.mrb[62].mxu0  ;;  %2269 = vmatprep.mubr.bf16.mxu0 %v2010_v59 }
 0x5bc   : > { %3327 = vtanh.f32 %v1927_v60  ;;  %v1931_v61 = vadd.f32 %v1930_v6, %v4419_v20  ;;  %v1932_v63 = vpop.f32.mrb[63].mxu0  ;;  %2270 = vmatmul.mubr.bf16.gmra.mrb[84].mxu0 %v2009_v56 }
 0x5bd   : > { %3329 = vtanh.f32 %v1929_v62  ;;  %v1933_v1 = vadd.f32 %v1932_v63, %v4422_v22 }
 0x5be   : > { %v3320_v3 = vpop.eup %3319  ;;  %3331 = vtanh.f32 %v1931_v61 }
 0x5bf   : > { %v3322_v52 = vpop.eup %3321  ;;  %3333 = vtanh.f32 %v1933_v1 }
 0x5c0   : > { %v3324_v57 = vpop.eup %3323 }
 0x5c1   : > { %v3326_v7 = vpop.eup %3325  ;;  %v1936_v8 = vpop.f32.mrb[64].mxu0  ;;  %v2011_v9 = vpack.c.bf16 %v3324_v57, %v3320_v3 }
 0x5c2   : > { %v1937_v10 = vadd.f32 %v1936_v8, %v4419_v20  ;;  %v1938_v12 = vpop.f32.mrb[65].mxu0  ;;  %v2012_v13 = vpack.c.bf16 %v3326_v7, %v3322_v52 }
 0x5c3   : > { %v1939_v15 = vadd.f32 %v1938_v12, %v4422_v22  ;;  %v1940_v17 = vpop.f32.mrb[66].mxu0 }
 0x5c4   : > { %3335 = vtanh.f32 %v1937_v10  ;;  %v1941_v0 = vadd.f32 %v1940_v17, %v4419_v20  ;;  %v1942_v14 = vpop.f32.mrb[67].mxu0  ;;  %2279 = vmatprep.mubr.bf16.mxu1 %v2012_v13 }
 0x5c5   : > { %3337 = vtanh.f32 %v1939_v15  ;;  %v1943_v18 = vadd.f32 %v1942_v14, %v4422_v22  ;;  %2280 = vmatmul.mubr.bf16.vlgmr.msra.gmra.mrb[48].mxu1 %v2011_v9 }
 0x5c6   : > { %v3328_v19 = vpop.eup %3327  ;;  %3339 = vtanh.f32 %v1941_v0 }
 0x5c7   : > { %v3330_v21 = vpop.eup %3329  ;;  %3341 = vtanh.f32 %v1943_v18 }
 0x5c8   : > { %v3332_v23 = vpop.eup %3331 }
 0x5c9   : > { %v3334_v24 = vpop.eup %3333  ;;  %v1946_v25 = vpop.f32.mrb[68].mxu0  ;;  %v2013_v11 = vpack.c.bf16 %v3332_v23, %v3328_v19 }
 0x5ca   : > { %v1947_v16 = vadd.f32 %v1946_v25, %v4419_v20  ;;  %v1948_v26 = vpop.f32.mrb[69].mxu0  ;;  %v2014_v27 = vpack.c.bf16 %v3334_v24, %v3330_v21 }
 0x5cb   : > { %v1949_v28 = vadd.f32 %v1948_v26, %v4422_v22  ;;  %v1950_v29 = vpop.f32.mrb[70].mxu0 }
 0x5cc   : > { %3343 = vtanh.f32 %v1947_v16  ;;  %v1951_v34 = vadd.f32 %v1950_v29, %v4419_v20  ;;  %v1952_v45 = vpop.f32.mrb[71].mxu0  ;;  %2289 = vmatprep.mubr.bf16.mxu1 %v2014_v27 }
 0x5cd   : > { %3345 = vtanh.f32 %v1949_v28  ;;  %v1953_v30 = vadd.f32 %v1952_v45, %v4422_v22  ;;  %2290 = vmatmul.mubr.bf16.gmra.mrb[52].mxu1 %v2013_v11 }
 0x5ce   : > { %v3336_v32 = vpop.eup %3335  ;;  %3347 = vtanh.f32 %v1951_v34 }
 0x5cf   : > { %v3338_v33 = vpop.eup %3337  ;;  %3349 = vtanh.f32 %v1953_v30 }
 0x5d0   : > { %v3340_v31 = vpop.eup %3339 }
 0x5d1   : > { %v3342_v38 = vpop.eup %3341  ;;  %v1956_v36 = vpop.f32.mrb[72].mxu0  ;;  %v2015_v39 = vpack.c.bf16 %v3340_v31, %v3336_v32 }
 0x5d2   : > { %v1957_v41 = vadd.f32 %v1956_v36, %v4419_v20  ;;  %v1958_v42 = vpop.f32.mrb[73].mxu0  ;;  %v2016_v44 = vpack.c.bf16 %v3342_v38, %v3338_v33 }
 0x5d3   : > { %v1959_v46 = vadd.f32 %v1958_v42, %v4422_v22  ;;  %v1960_v47 = vpop.f32.mrb[74].mxu0 }
 0x5d4   : > { %3351 = vtanh.f32 %v1957_v41  ;;  %v1961_v40 = vadd.f32 %v1960_v47, %v4419_v20  ;;  %v1962_v48 = vpop.f32.mrb[75].mxu0  ;;  %2299 = vmatprep.mubr.bf16.mxu1 %v2016_v44 }
 0x5d5   : > { %3353 = vtanh.f32 %v1959_v46  ;;  %v1963_v37 = vadd.f32 %v1962_v48, %v4422_v22  ;;  %2300 = vmatmul.mubr.bf16.gmra.mrb[56].mxu1 %v2015_v39 }
 0x5d6   : > { %v3344_v49 = vpop.eup %3343  ;;  %3355 = vtanh.f32 %v1961_v40 }
 0x5d7   : > { %v3346_v43 = vpop.eup %3345  ;;  %3357 = vtanh.f32 %v1963_v37 }
 0x5d8   : > { %v3348_v35 = vpop.eup %3347 }
 0x5d9   : > { %v3350_v50 = vpop.eup %3349  ;;  %v1966_v51 = vpop.f32.mrb[76].mxu0  ;;  %v2017_v5 = vpack.c.bf16 %v3348_v35, %v3344_v49 }
 0x5da   : > { %v1967_v53 = vadd.f32 %v1966_v51, %v4419_v20  ;;  %v1968_v54 = vpop.f32.mrb[77].mxu0  ;;  %v2018_v56 = vpack.c.bf16 %v3350_v50, %v3346_v43 }
 0x5db   : > { %v1969_v58 = vadd.f32 %v1968_v54, %v4422_v22  ;;  %v1970_v59 = vpop.f32.mrb[78].mxu0 }
 0x5dc   : > { %3359 = vtanh.f32 %v1967_v53  ;;  %v1971_v60 = vadd.f32 %v1970_v59, %v4419_v20  ;;  %v1972_v55 = vpop.f32.mrb[79].mxu0  ;;  %2309 = vmatprep.mubr.bf16.mxu1 %v2018_v56 }
 0x5dd   : > { %3361 = vtanh.f32 %v1969_v58  ;;  %v1973_v62 = vadd.f32 %v1972_v55, %v4422_v22  ;;  %2310 = vmatmul.mubr.bf16.gmra.mrb[60].mxu1 %v2017_v5  ;;  %v2055_v22 = vld [vmem:[%s4694_s30] sm:$0x3]  ;;  %s3507_s30 = scalar_lea.vmem %s4539_s29, 2048 }
 0x5de   : > { %v3352_v6 = vpop.eup %3351  ;;  %3363 = vtanh.f32 %v1971_v60  ;;  %v4464_v12 = vrot.slane %v2055_v22, %v4001_v2  ;;  %v4467_v13 = vrot.slane %v2055_v22, %v4006_v4  ;;  %p3508_p2 = scmp.ne.s32.totalorder %s4539_s29, %s3507_s30  ;;  %p3515_p11 = scmp.lt.s32.totalorder %s3513_s24, %s3507_s30 }
 0x5df   : > { %v3354_v61 = vpop.eup %3353  ;;  %3365 = vtanh.f32 %v1973_v62 }
 0x5e0   : > { %v3356_v63 = vpop.eup %3355  ;;  %p3509_p4 = pnand %p3508_p2, %p4698_p3  ;;  %p3516_p5 = por %p3515_p11, %p3514_p8 }
 0x5e1   : > { %v3358_v1 = vpop.eup %3357  ;;  %v2019_v3 = vpack.c.bf16 %v3356_v63, %v3352_v6 }
 0x5e2   : > { %v2020_v52 = vpack.c.bf16 %v3358_v1, %v3354_v61  ;;  %p3510_p7 = pneg %p3509_p4 }
 0x5e4   : > { %2319 = vmatprep.mubr.bf16.mxu1 %v2020_v52  ;;  %p3517_p0 = pnand %p3516_p5, %p3510_p7 }
 0x5e5   : > { %2320 = vmatmul.mubr.bf16.gmra.mrb[64].mxu1 %v2019_v3 }
 0x5e6   : > { %v3360_v57 = vpop.eup %3359 }
 0x5e7   : > { %v3362_v7 = vpop.eup %3361 }
 0x5e8   : > { %v3364_v20 = vpop.eup %3363 }
 0x5e9   : > { %v3366_v8 = vpop.eup %3365  ;;  %v2021_v9 = vpack.c.bf16 %v3364_v20, %v3360_v57 }
 0x5ea   : > { %v2022_v10 = vpack.c.bf16 %v3366_v8, %v3362_v7 }
 0x5ec   : > { %2329 = vmatprep.mubr.bf16.mxu1 %v2022_v10 }
 0x5ed   : > { %2330 = vmatmul.mubr.bf16.gmra.mrb[68].mxu1 %v2021_v9 }
 0x687   : > { %v2261_v15 = vpop.f32.mrb[80].mxu0 }
 0x688   : > { %v2262_v17 = vadd.f32 %v2261_v15, %v4464_v12  ;;  %v2263_v0 = vpop.f32.mrb[81].mxu0 }
 0x689   : > { %v2264_v14 = vadd.f32 %v2263_v0, %v4467_v13  ;;  %v2265_v18 = vpop.f32.mrb[82].mxu0 }
 0x68a   : > { %2340 = vst [vmem:[%s4471_s13] sm:$0xff] %v2262_v17  ;;  %v2266_v19 = vadd.f32 %v2265_v18, %v4464_v12  ;;  %v2267_v2 = vpop.f32.mrb[83].mxu0 }
 0x68b   : > { %2356 = vst [vmem:[%s4475_s14] sm:$0xff] %v2264_v14  ;;  %v2268_v4 = vadd.f32 %v2267_v2, %v4467_v13 }
 0x68c   : > { %2341 = vst [vmem:[%s4471_s13 + $0x8] sm:$0xff] %v2266_v19 }
 0x68d   : > { %2357 = vst [vmem:[%s4475_s14 + $0x8] sm:$0xff] %v2268_v4 }
 0x68f   : > { %v2271_v21 = vpop.f32.mrb[84].mxu0 }
 0x690   : > { %v2272_v23 = vadd.f32 %v2271_v21, %v4464_v12  ;;  %v2273_v24 = vpop.f32.mrb[85].mxu0 }
 0x691   : > { %v2274_v25 = vadd.f32 %v2273_v24, %v4467_v13  ;;  %v2275_v11 = vpop.f32.mrb[86].mxu0 }
 0x692   : > { %2342 = vst [vmem:[%s4471_s13 + $0x10] sm:$0xff] %v2272_v23  ;;  %v2276_v16 = vadd.f32 %v2275_v11, %v4464_v12  ;;  %v2277_v26 = vpop.f32.mrb[87].mxu0 }
 0x693   : > { %2358 = vst [vmem:[%s4475_s14 + $0x10] sm:$0xff] %v2274_v25  ;;  %v2278_v27 = vadd.f32 %v2277_v26, %v4467_v13 }
 0x694   : > { %2343 = vst [vmem:[%s4471_s13 + $0x18] sm:$0xff] %v2276_v16 }
 0x695   : > { %2359 = vst [vmem:[%s4475_s14 + $0x18] sm:$0xff] %v2278_v27 }
 0x698   : > { %v2281_v28 = vpop.f32.mrb[48].mxu1 }
 0x699   : > { %v2282_v29 = vadd.f32 %v2281_v28, %v4464_v12  ;;  %v2283_v34 = vpop.f32.mrb[49].mxu1 }
 0x69a   : > { %v2284_v45 = vadd.f32 %v2283_v34, %v4467_v13  ;;  %v2285_v30 = vpop.f32.mrb[50].mxu1 }
 0x69b   : > { %2344 = vst [vmem:[%s4471_s13 + $0x20] sm:$0xff] %v2282_v29  ;;  %v2286_v32 = vadd.f32 %v2285_v30, %v4464_v12  ;;  %v2287_v33 = vpop.f32.mrb[51].mxu1 }
 0x69c   : > { %2360 = vst [vmem:[%s4475_s14 + $0x20] sm:$0xff] %v2284_v45  ;;  %v2288_v31 = vadd.f32 %v2287_v33, %v4467_v13 }
 0x69d   : > { %2345 = vst [vmem:[%s4471_s13 + $0x28] sm:$0xff] %v2286_v32 }
 0x69e   : > { %2361 = vst [vmem:[%s4475_s14 + $0x28] sm:$0xff] %v2288_v31 }
 0x6a0   : > { %v2291_v38 = vpop.f32.mrb[52].mxu1 }
 0x6a1   : > { %v2292_v36 = vadd.f32 %v2291_v38, %v4464_v12  ;;  %v2293_v39 = vpop.f32.mrb[53].mxu1 }
 0x6a2   : > { %v2294_v41 = vadd.f32 %v2293_v39, %v4467_v13  ;;  %v2295_v42 = vpop.f32.mrb[54].mxu1 }
 0x6a3   : > { %2346 = vst [vmem:[%s4471_s13 + $0x30] sm:$0xff] %v2292_v36  ;;  %v2296_v44 = vadd.f32 %v2295_v42, %v4464_v12  ;;  %v2297_v46 = vpop.f32.mrb[55].mxu1 }
 0x6a4   : > { %2362 = vst [vmem:[%s4475_s14 + $0x30] sm:$0xff] %v2294_v41  ;;  %v2298_v47 = vadd.f32 %v2297_v46, %v4467_v13 }
 0x6a5   : > { %2347 = vst [vmem:[%s4471_s13 + $0x38] sm:$0xff] %v2296_v44 }
 0x6a6   : > { %2363 = vst [vmem:[%s4475_s14 + $0x38] sm:$0xff] %v2298_v47 }
 0x6a8   : > { %v2301_v40 = vpop.f32.mrb[56].mxu1 }
 0x6a9   : > { %v2302_v48 = vadd.f32 %v2301_v40, %v4464_v12  ;;  %v2303_v37 = vpop.f32.mrb[57].mxu1 }
 0x6aa   : > { %v2304_v49 = vadd.f32 %v2303_v37, %v4467_v13  ;;  %v2305_v43 = vpop.f32.mrb[58].mxu1 }
 0x6ab   : > { %2348 = vst [vmem:[%s4471_s13 + $0x40] sm:$0xff] %v2302_v48  ;;  %v2306_v35 = vadd.f32 %v2305_v43, %v4464_v12  ;;  %v2307_v50 = vpop.f32.mrb[59].mxu1 }
 0x6ac   : > { %2364 = vst [vmem:[%s4475_s14 + $0x40] sm:$0xff] %v2304_v49  ;;  %v2308_v51 = vadd.f32 %v2307_v50, %v4467_v13 }
 0x6ad   : > { %2349 = vst [vmem:[%s4471_s13 + $0x48] sm:$0xff] %v2306_v35 }
 0x6ae   : > { %2365 = vst [vmem:[%s4475_s14 + $0x48] sm:$0xff] %v2308_v51 }
 0x6b0   : > { %v2311_v5 = vpop.f32.mrb[60].mxu1 }
 0x6b1   : > { %v2312_v53 = vadd.f32 %v2311_v5, %v4464_v12  ;;  %v2313_v54 = vpop.f32.mrb[61].mxu1 }
 0x6b2   : > { %v2314_v56 = vadd.f32 %v2313_v54, %v4467_v13  ;;  %v2315_v58 = vpop.f32.mrb[62].mxu1 }
 0x6b3   : > { %2350 = vst [vmem:[%s4471_s13 + $0x50] sm:$0xff] %v2312_v53  ;;  %v2316_v59 = vadd.f32 %v2315_v58, %v4464_v12  ;;  %v2317_v60 = vpop.f32.mrb[63].mxu1 }
 0x6b4   : > { %2366 = vst [vmem:[%s4475_s14 + $0x50] sm:$0xff] %v2314_v56  ;;  %v2318_v55 = vadd.f32 %v2317_v60, %v4467_v13 }
 0x6b5   : > { %2351 = vst [vmem:[%s4471_s13 + $0x58] sm:$0xff] %v2316_v59 }
 0x6b6   : > { %2367 = vst [vmem:[%s4475_s14 + $0x58] sm:$0xff] %v2318_v55 }
 0x6b8   : > { %v2321_v62 = vpop.f32.mrb[64].mxu1 }
 0x6b9   : > { %v2322_v6 = vadd.f32 %v2321_v62, %v4464_v12  ;;  %v2323_v61 = vpop.f32.mrb[65].mxu1 }
 0x6ba   : > { %v2324_v63 = vadd.f32 %v2323_v61, %v4467_v13  ;;  %v2325_v1 = vpop.f32.mrb[66].mxu1 }
 0x6bb   : > { %2352 = vst [vmem:[%s4471_s13 + $0x60] sm:$0xff] %v2322_v6  ;;  %v2326_v3 = vadd.f32 %v2325_v1, %v4464_v12  ;;  %v2327_v52 = vpop.f32.mrb[67].mxu1 }
 0x6bc   : > { %2368 = vst [vmem:[%s4475_s14 + $0x60] sm:$0xff] %v2324_v63  ;;  %v2328_v57 = vadd.f32 %v2327_v52, %v4467_v13 }
 0x6bd   : > { %2353 = vst [vmem:[%s4471_s13 + $0x68] sm:$0xff] %v2326_v3 }
 0x6be   : > { %2369 = vst [vmem:[%s4475_s14 + $0x68] sm:$0xff] %v2328_v57 }
 0x6c0   : > { %v2331_v7 = vpop.f32.mrb[68].mxu1 }
 0x6c1   : > { %v2332_v20 = vadd.f32 %v2331_v7, %v4464_v12  ;;  %v2333_v8 = vpop.f32.mrb[69].mxu1 }
 0x6c2   : > { %v2334_v9 = vadd.f32 %v2333_v8, %v4467_v13  ;;  %v2335_v10 = vpop.f32.mrb[70].mxu1 }
 0x6c3   : > { %2354 = vst [vmem:[%s4471_s13 + $0x70] sm:$0xff] %v2332_v20  ;;  %v2336_v22 = vadd.f32 %v2335_v10, %v4464_v12  ;;  %v2337_v15 = vpop.f32.mrb[71].mxu1 }
 0x6c4   : > { %2370 = vst [vmem:[%s4475_s14 + $0x70] sm:$0xff] %v2334_v9  ;;  %v2338_v17 = vadd.f32 %v2337_v15, %v4467_v13 }
 0x6c5   : > { %2355 = vst [vmem:[%s4471_s13 + $0x78] sm:$0xff] %v2336_v22 }
 0x6c6   : > { %2371 = vst [vmem:[%s4475_s14 + $0x78] sm:$0xff] %v2338_v17 }
 0x6c7   : > { %3520 = shalt.err (!%p3517_p0)
}
 0x6c8   : > { %s3521_s13 = scalar_lea.hbm %s4537_s20, 2048  ;;  %s3525_s28 = scalar_lea.hbm %s4696_s1, 4096 }
 0x6c9   : > { %p3522_p6 = scmp.ne.s32.totalorder %s4537_s20, %s3521_s13  ;;  %p3526_p13 = scmp.lt.u32.totalorder %s4537_s20, %s4696_s1 }
 0x6ca   : > { %p3527_p12 = scmp.lt.u32.totalorder %s3525_s28, %s3521_s13  ;;  %p3529_p2 = scmp.lt.u32.totalorder %s3521_s13, %s4537_s20 }
 0x6cb   : > { %p3523_p9 = pnand %p3522_p6, %p4698_p3 }
 0x6cc   : > { %p3528_p1 = por %p3527_p12, %p3526_p13 }
 0x6cd   : > { %p3524_p10 = pneg %p3523_p9 }
 0x6ce   : > { %p3530_p4 = por %p3529_p2, %p3528_p1 }
 0x6d0   : > { %p3531_p7 = pnand %p3530_p4, %p3524_p10 }
 0x6d2   : > { %3534 = shalt.err (!%p3531_p7)
}
 0x6d3   : > { %s3627_s30 = smov 128   ;;  %s3628_s27 = smov 8  }
 0x6d4   : > { %3064 = dma.vmem_to_hbm [thread:$0]  (%p4698_p3), %s4539_s29, 2048, %s4537_s20, %s2469_s0, %s3627_s30, %s3627_s30, %s3628_s27  }
 0x6d5   : > { %s2474_s24 = scalar_lea.sflag [#allocation13], %s4457_s15  ;;  %s3535_s13 = scalar_lea.vmem %s4550_s22, 2048 }
 0x6d6   : > { %p3536_p8 = scmp.ne.s32.totalorder %s4550_s22, %s3535_s13  ;;  %s3629_s14 = smov [#allocation12]  }
 0x6d7   : > { %s3539_s21 = sshll.u32 %s3629_s14, 4  ;;  %s3540_s21 = int_to_ptr.vmem [resolvable:$false] %s3539_s21 }
 0x6d8   : > { %p3537_p11 = pnand %p3536_p8, %p4698_p3  ;;  %s3541_s28 = scalar_lea.vmem %s3540_s21, 4096 }
 0x6d9   : > { %p3542_p0 = scmp.lt.s32.totalorder %s4550_s22, %s3540_s21  ;;  %p3543_p6 = scmp.lt.s32.totalorder %s3541_s28, %s3535_s13 }
 0x6da   : > { %p3538_p5 = pneg %p3537_p11 }
 0x6db   : > { %p3544_p9 = por %p3543_p6, %p3542_p0 }
 0x6dd   : > { %p3545_p10 = pnand %p3544_p9, %p3538_p5 }
 0x6df   : > { %3548 = shalt.err (!%p3545_p10)
}
 0x6e0   : > { %s3549_s29 = scalar_lea.hbm %s4548_s18, 2048  ;;  %s3553_s26 = scalar_lea.hbm %s4697_s23, 4096 }
 0x6e1   : > { %p3550_p13 = scmp.ne.s32.totalorder %s4548_s18, %s3549_s29  ;;  %p3554_p2 = scmp.lt.u32.totalorder %s4548_s18, %s4697_s23 }
 0x6e2   : > { %p3555_p4 = scmp.lt.u32.totalorder %s3553_s26, %s3549_s29  ;;  %p3557_p8 = scmp.lt.u32.totalorder %s3549_s29, %s4548_s18 }
 0x6e3   : > { %p3551_p12 = pnand %p3550_p13, %p4698_p3 }
 0x6e4   : > { %p3556_p7 = por %p3555_p4, %p3554_p2 }
 0x6e5   : > { %p3552_p1 = pneg %p3551_p12 }
 0x6e6   : > { %p3558_p11 = por %p3557_p8, %p3556_p7 }
 0x6e8   : > { %p3559_p5 = pnand %p3558_p11, %p3552_p1 }
 0x6ea   : > { %3562 = shalt.err (!%p3559_p5)
}
 0x6eb   : > { %3065 = dma.vmem_to_hbm [thread:$0]  (%p4698_p3), %s4550_s22, 2048, %s4548_s18, %s2474_s24, %s3627_s30, %s3627_s30, %s3628_s27  }
 0x6ec PF: > { %s4699_s13 = sld [smem:[#allocation21_spill]]  ;;  %s4700_s21 = sld [smem:[#allocation19_spill]] }
 0x6ed   : > { %s4701_s28 = sld [smem:[#allocation25_spill]] }
 0x6f2   : > { %p3101_p0 = scmp.ge.s32.totalorder %s4699_s13, 2  ;;  %s2536_s20 = sand.u32 1, %s4700_s21  }
 0x6f3   : > { %p4702_p6 = scmp.ne.s32.totalorder %s4701_s28, 0  ;;  %s2537_s29 = scalar_lea.sflag [#allocation4], %s2536_s20 }
 0x6f5   : > { %p3085_p9 = pnand %p3101_p0, %p4702_p6 }
 0x6f7   : > { %3592 = dma.done.wait (!%p3085_p9), %s2537_s29, 2048  }
 0x6f8   : > { %3594 = vsyncadd (!%p3085_p9), %s2537_s29, 4294965248  ;;  %s2546_s19 = scalar_lea.sflag [#allocation13], %s2536_s20 }
 0x6f9   : > { %3596 = dma.done.wait (!%p3085_p9), %s2546_s19, 2048  }
 0x6fa   : > { %3598 = vsyncadd (!%p3085_p9), %s2546_s19, 4294965248  ;;  %s4703_s27 = sld [smem:[#allocation22_spill]]  ;;  %s4704_s15 = sld [smem:[#allocation20_spill]] }
 0x6fb   : > { %s4705_s26 = sld [smem:[#allocation23_spill]]  ;;  %s4706_s24 = smov %s3605_s25 }
 0x700   : > { %p34_p3 = scmp.ge.s32.totalorder %s4703_s27, 4   ;;  %s4707_s25 = smov %s4704_s15 }
 0x702   :  { %36 = sbr.rel (!%p34_p3) target bundleno = 15 (0xf), region = 176 }
 0x709   :  { %2567 = vsyncpa [#allocation3], 1 }
 0x70a   :  { %2569 = vsyncpa [#allocation3 + $0x1], 1 }
 0x70b   :  { %2570 = vsyncpa [#allocation6], 1 }
 0x70c   :  { %2571 = vsyncpa [#allocation9], 1 }
 0x70d   :  { %2572 = vsyncpa [#allocation4], 1 }
 0x70e   :  { %2574 = vsyncpa [#allocation4 + $0x1], 1 }
 0x70f   :  { %2575 = vsyncpa [#allocation13], 1 }
 0x710   :  { %2577 = vsyncpa [#allocation13 + $0x1], 1 }

</bundles_post_ra>
